<compile_context>
chip_gen: v7x
topology: tpu7x:2x2x1
jax: 0.10.0
libtpu: 0.0.40
codegen_flags: <defaults>
</compile_context>

<pallas_src>
import functools

import jax
import jax.numpy as jnp
from jax.experimental import pallas as pl
from jax.experimental.pallas import tpu as pltpu

BN_EPS = 1e-5
LANE = 128                       # lane-dense channel padding target
ACC_BYTES = 128 * 1024           # per-step f32 accumulator budget for the 3x3 conv
VMEM_LIMIT = 48 * 1024 * 1024    # fits v7x (64 MiB physical); v5e/v6e have headroom


def _round_up(x, m):
    return (x + m - 1) // m * m


def _pad_last(a, target):
    pad = target - a.shape[-1]
    if pad == 0:
        return a
    cfg = [(0, 0)] * (a.ndim - 1) + [(0, pad)]
    return jnp.pad(a, cfg)


def _pad2(w, kp, cop):
    k, co = w.shape
    return jnp.pad(w, ((0, kp - k), (0, cop - co)))


def _pad_weight(w, cin_p, cout_p):
    """w: (kh, kw, Cin, Cout) -> zero-padded (kh, kw, cin_p, cout_p)."""
    _, _, ci, co = w.shape
    return jnp.pad(w, ((0, 0), (0, 0), (0, cin_p - ci), (0, cout_p - co)))


def _fold_w3x3(w):
    """(3, 3, C, Co) -> (3, 3*C, Co): kw taps folded into the contraction (K)."""
    kh, kw, c, co = w.shape
    return w.reshape(kh, kw * c, co).astype(jnp.bfloat16)


# ----------------------------------------------------------------------------
# Kernel 1: row/col/K-tiled matmul with BN partial statistics.
# Used for the strided conv1 (+fused 1x1 downsample) on a 9*Cin im2col operand
# and for the 1x1 stride-1 downsample.  Grid = (M tiles, N tiles, K tiles).
# ----------------------------------------------------------------------------
def _mm_stats_kernel(x_ref, w_ref, y_ref, ps_ref, acc_ref):
    k = pl.program_id(2)

    @pl.when(k == 0)
    def _():
        acc_ref[...] = jnp.zeros_like(acc_ref)

    acc_ref[...] += jnp.dot(x_ref[...], w_ref[...],
                            preferred_element_type=jnp.float32)

    @pl.when(k == pl.num_programs(2) - 1)
    def _():
        acc = acc_ref[...]
        y_ref[...] = acc.astype(y_ref.dtype)           # bf16 activation write
        # BN partials from the f32 accumulator, two direct stores (no concat copy)
        ps_ref[0, 0:1, :] = jnp.sum(acc, axis=0, keepdims=True)
        ps_ref[0, 1:2, :] = jnp.sum(acc * acc, axis=0, keepdims=True)


def _matmul_stats(x, w, out_dtype=jnp.bfloat16):
    """x: (P, K_p) bf16, w: (K_p, Co) bf16 (K_p, Co multiples of 128).
    Returns y: (P, Co) out_dtype and BN partials (n_row_tiles, 2, Co) f32."""
    p, kdim = x.shape
    co = w.shape[-1]
    tm = min(256, _round_up(p, 8))
    p_pad = _round_up(p, tm)
    if p_pad != p:
        x = jnp.pad(x, ((0, p_pad - p), (0, 0)))        # zero rows: no effect on stats
    tn = 256 if co % 256 == 0 else 128                   # 256-wide N for v6e/v7x MXU
    tk = 512 if kdim % 512 == 0 else (256 if kdim % 256 == 0 else 128)
    nm, nn, nk = p_pad // tm, co // tn, kdim // tk
    y, ps = pl.pallas_call(
        _mm_stats_kernel,
        grid=(nm, nn, nk),
        in_specs=[pl.BlockSpec((tm, tk), lambda i, j, k: (i, k)),
                  pl.BlockSpec((tk, tn), lambda i, j, k: (k, j))],
        out_specs=[pl.BlockSpec((tm, tn), lambda i, j, k: (i, j)),
                   pl.BlockSpec((1, 2, tn), lambda i, j, k: (i, 0, j))],
        out_shape=[jax.ShapeDtypeStruct((p_pad, co), out_dtype),
                   jax.ShapeDtypeStruct((nm, 2, co), jnp.float32)],
        scratch_shapes=[pltpu.VMEM((tm, tn), jnp.float32)],
        compiler_params=pltpu.CompilerParams(
            dimension_semantics=("parallel", "parallel", "arbitrary"),
            vmem_limit_bytes=VMEM_LIMIT),
    )(x, w)
    return y[:p], ps


# ----------------------------------------------------------------------------
# Kernel 2: stride-1 3x3 conv, row-tiled with a 2-row halo.  Per kh, the 3 kw
# taps are folded into the contraction -> one (rows, 3C) @ (3C, Co) MXU matmul.
# Grid = (N * row_tiles,) fully parallel.  Emits BN partials per tile.
# ----------------------------------------------------------------------------
def _conv3x3_kernel(x_ref, w_ref, y_ref, ps_ref):
    # x: (1, th+2, Wo+2, C)   w: (3, 3*C, Co)   y: (1, th, Wo, Co)   ps: (1, 2, Co)
    _, th, wo, co = y_ref.shape
    c = x_ref.shape[3]
    acc = jnp.zeros((th * wo, co), jnp.float32)          # bounded <= ACC_BYTES
    for kh in range(3):
        win = jnp.concatenate(
            [x_ref[0, kh:kh + th, kw:kw + wo, :] for kw in range(3)], axis=-1)
        acc = acc + jnp.dot(win.reshape(th * wo, 3 * c), w_ref[kh],
                            preferred_element_type=jnp.float32)
    y_ref[0] = acc.reshape(th, wo, co).astype(y_ref.dtype)
    ps_ref[0, 0:1, :] = jnp.sum(acc, axis=0, keepdims=True)
    ps_ref[0, 1:2, :] = jnp.sum(acc * acc, axis=0, keepdims=True)


def _pick_row_tile(ho, wo, co):
    max_th = max(1, ACC_BYTES // (wo * co * 4))
    th = min(ho, max_th)
    while ho % th:
        th -= 1
    return th


def _conv3x3_s1(x_pad, w_folded, out_dtype):
    """x_pad: (N, Ho+2, Wo+2, C) bf16, w_folded: (3, 3*C, Co) bf16 ->
    y: (N, Ho, Wo, Co) out_dtype, BN partials (N*T, 2, Co) f32."""
    n, hp, wp, c = x_pad.shape
    ho, wo = hp - 2, wp - 2
    co = w_folded.shape[-1]
    th = _pick_row_tile(ho, wo, co)
    t = ho // th
    if t == 1:
        x_tiles = x_pad
    else:
        # overlapping (2-row halo) row tiles, built once by XLA (~(th+2)/th x bytes)
        x_tiles = jnp.stack([x_pad[:, i * th:i * th + th + 2] for i in range(t)],
                            axis=1).reshape(n * t, th + 2, wp, c)
    nt = n * t
    y, ps = pl.pallas_call(
        _conv3x3_kernel,
        grid=(nt,),
        in_specs=[pl.BlockSpec((1, th + 2, wp, c), lambda i: (i, 0, 0, 0)),
                  pl.BlockSpec((3, 3 * c, co), lambda i: (0, 0, 0))],
        out_specs=[pl.BlockSpec((1, th, wo, co), lambda i: (i, 0, 0, 0)),
                   pl.BlockSpec((1, 2, co), lambda i: (i, 0, 0))],
        out_shape=[jax.ShapeDtypeStruct((nt, th, wo, co), out_dtype),
                   jax.ShapeDtypeStruct((nt, 2, co), jnp.float32)],
        compiler_params=pltpu.CompilerParams(
            dimension_semantics=("parallel",),
            vmem_limit_bytes=VMEM_LIMIT),
    )(x_tiles, w_folded)
    return y.reshape(n, ho, wo, co), ps


# ----------------------------------------------------------------------------
# Kernel 3: fused bn2 + (downsample BN or raw) identity + add + ReLU.
# ----------------------------------------------------------------------------
def _bn_add_relu_kernel(y2_ref, id_ref, s2_ref, b2_ref, sd_ref, bd_ref, o_ref):
    out = (y2_ref[...] * s2_ref[...] + b2_ref[...]
           + id_ref[...].astype(jnp.float32) * sd_ref[...] + bd_ref[...])
    o_ref[...] = jnp.maximum(out, 0.0).astype(o_ref.dtype)


def _bn_add_relu(y2, identity, s2, b2, sd, bd):
    """out = relu(y2*s2 + b2 + identity*sd + bd); y2 f32 (P, C), identity bf16."""
    p, co = y2.shape
    tile = min(1024, _round_up(p, 8))                    # mem-bound: big row tiles
    p_pad = _round_up(p, tile)
    if p_pad != p:
        y2 = jnp.pad(y2, ((0, p_pad - p), (0, 0)))
        identity = jnp.pad(identity, ((0, p_pad - p), (0, 0)))
    vec = lambda v: v.reshape(1, co).astype(jnp.float32)
    out = pl.pallas_call(
        _bn_add_relu_kernel,
        grid=(p_pad // tile,),
        in_specs=[pl.BlockSpec((tile, co), lambda i: (i, 0)),
                  pl.BlockSpec((tile, co), lambda i: (i, 0))] +
                 [pl.BlockSpec((1, co), lambda i: (0, 0))] * 4,
        out_specs=pl.BlockSpec((tile, co), lambda i: (i, 0)),
        out_shape=jax.ShapeDtypeStruct((p_pad, co), jnp.float32),
        compiler_params=pltpu.CompilerParams(
            dimension_semantics=("parallel",),
            vmem_limit_bytes=VMEM_LIMIT),
    )(y2, identity, vec(s2), vec(b2), vec(sd), vec(bd))
    return out[:p]


# ----------------------------------------------------------------------------
# BN finalize: fold batch statistics + affine into one per-channel scale/bias.
# ----------------------------------------------------------------------------
def _bn_scale_bias(partial_sums, n_rows, gamma_p, beta_p):
    # TODO(synk): E[x^2]-E[x]^2 in f32 can cancel for very large N*H*W; fine here.
    c = partial_sums.shape[-1]
    s = jnp.sum(partial_sums.reshape(-1, 2, c), axis=0)
    mean = s[0] / n_rows
    var = jnp.maximum(s[1] / n_rows - mean * mean, 0.0)   # biased (training) variance
    scale = gamma_p * jax.lax.rsqrt(var + BN_EPS)
    bias = beta_p - mean * scale
    return scale, bias


# ----------------------------------------------------------------------------
# Parameters (deterministic, synthetic). Weight layout is HWIO (kh, kw, Cin, Cout).
# ----------------------------------------------------------------------------
def init_params(key, in_channels, out_channels, stride):
    ks = jax.random.split(key, 10)
    p = {
        "w1": 0.1 * jax.random.normal(ks[0], (3, 3, in_channels, out_channels), jnp.float32),
        "g1": 1.0 + 0.1 * jax.random.normal(ks[1], (out_channels,), jnp.float32),
        "b1": 0.1 * jax.random.normal(ks[2], (out_channels,), jnp.float32),
        "w2": 0.1 * jax.random.normal(ks[3], (3, 3, out_channels, out_channels), jnp.float32),
        "g2": 1.0 + 0.1 * jax.random.normal(ks[4], (out_channels,), jnp.float32),
        "b2": 0.1 * jax.random.normal(ks[5], (out_channels,), jnp.float32),
    }
    if stride != 1 or in_channels != out_channels:
        p["wd"] = 0.1 * jax.random.normal(ks[6], (1, 1, in_channels, out_channels), jnp.float32)
        p["gd"] = 1.0 + 0.1 * jax.random.normal(ks[7], (out_channels,), jnp.float32)
        p["bd"] = 0.1 * jax.random.normal(ks[8], (out_channels,), jnp.float32)
    return p


# ----------------------------------------------------------------------------
# Forward pass (NCHW in, NCHW out — same as PyTorch ResNetBlock.forward).
# ----------------------------------------------------------------------------
def resnet_block_forward(x_nchw, params, stride):
    x = jnp.transpose(x_nchw, (0, 2, 3, 1)).astype(jnp.float32)     # -> NHWC
    N, H, W, Cin = x.shape
    Cout = params["w1"].shape[-1]
    cout_p = _round_up(Cout, LANE)
    has_ds = "wd" in params

    Ho = (H + 2 - 3) // stride + 1
    Wo = (W + 2 - 3) // stride + 1
    P = N * Ho * Wo                                       # rows after conv1

    g1p, b1p = _pad_last(params["g1"], cout_p), _pad_last(params["b1"], cout_p)
    g2p, b2p = _pad_last(params["g2"], cout_p), _pad_last(params["b2"], cout_p)

    xb = x.astype(jnp.bfloat16)
    yd_flat = psd = None

    if stride == 1:
        # ---- conv1: row-tiled 3x3 (stride 1) on channel-padded input ------------
        cin_p = _round_up(Cin, LANE)
        w1f = _fold_w3x3(_pad_weight(params["w1"], cin_p, cout_p))
        xp = jnp.pad(_pad_last(xb, cin_p), ((0, 0), (1, 1), (1, 1), (0, 0)))
        y1_img, ps1 = _conv3x3_s1(xp, w1f, out_dtype=jnp.bfloat16)
        if has_ds:    # 1x1 stride-1 downsample as a plain row-tiled matmul
            wdp = _pad2(params["wd"].reshape(Cin, Cout), cin_p, cout_p)
            yd_flat, psd = _matmul_stats(
                _pad_last(xb, cin_p).reshape(P, cin_p),
                wdp.astype(jnp.bfloat16), out_dtype=jnp.bfloat16)
    else:
        # ---- conv1 (3x3, stride s) + 1x1 stride-s downsample fused in ONE matmul.
        # im2col keeps the TRUE 9*Cin contraction (no Cin->128 zero padding of K);
        # the downsample weight sits at the centre tap (x_pad[h*s+1,w*s+1]==x[h*s,w*s]).
        K = 9 * Cin
        kp = _round_up(K, LANE)
        xp = jnp.pad(xb, ((0, 0), (1, 1), (1, 1), (0, 0)))
        cols = [xp[:, kh:kh + stride * (Ho - 1) + 1:stride,
                      kw:kw + stride * (Wo - 1) + 1:stride, :]
                for kh in range(3) for kw in range(3)]
        xcols = jnp.concatenate(cols, axis=-1).reshape(P, K)
        xcols = jnp.pad(xcols, ((0, 0), (0, kp - K)))
        w1f = _pad2(params["w1"].reshape(K, Cout), kp, cout_p)
        wdf = _pad2(jnp.zeros((9, Cin, Cout), jnp.float32)
                    .at[4].set(params["wd"].reshape(Cin, Cout))
                    .reshape(K, Cout), kp, cout_p)
        wcat = jnp.concatenate([w1f, wdf], axis=1).astype(jnp.bfloat16)  # N = 2*Cout_p
        y_cat, ps_cat = _matmul_stats(xcols, wcat, out_dtype=jnp.bfloat16)
        y1_img = y_cat[:, :cout_p].reshape(N, Ho, Wo, cout_p)
        ps1 = ps_cat[:, :, :cout_p]
        yd_flat = y_cat[:, cout_p:]
        psd = ps_cat[:, :, cout_p:]

    # ---- bn1 + ReLU + spatial pad: one XLA elementwise/pad fusion feeding conv2 ----
    scale1, bias1 = _bn_scale_bias(ps1, P, g1p, b1p)
    y1n = jnp.maximum(y1_img.astype(jnp.float32) * scale1 + bias1, 0.0)
    y1p = jnp.pad(y1n.astype(jnp.bfloat16), ((0, 0), (1, 1), (1, 1), (0, 0)))

    # ---- conv2: row-tiled 3x3, stride 1 ------------------------------------------
    w2f = _fold_w3x3(_pad_weight(params["w2"], cout_p, cout_p))
    y2_img, ps2 = _conv3x3_s1(y1p, w2f, out_dtype=jnp.float32)
    scale2, bias2 = _bn_scale_bias(ps2, P, g2p, b2p)

    # ---- identity branch scale/bias ------------------------------------------------
    if has_ds:
        gdp, bdp = _pad_last(params["gd"], cout_p), _pad_last(params["bd"], cout_p)
        scaled, biasd = _bn_scale_bias(psd, P, gdp, bdp)
        identity = yd_flat                                   # bf16, (P, cout_p)
    else:
        assert stride == 1 and Cin == Cout, "identity shortcut requires matching shape"
        scaled = jnp.ones((cout_p,), jnp.float32)
        biasd = jnp.zeros((cout_p,), jnp.float32)
        identity = _pad_last(xb, cout_p).reshape(P, cout_p)   # raw x, bf16

    # ---- bn2 + (bn_d) identity + add + ReLU in one fused elementwise kernel --------
    out = _bn_add_relu(y2_img.reshape(P, cout_p), identity,
                       scale2, bias2, scaled, biasd)
    out = out.reshape(N, Ho, Wo, cout_p)[:, :, :, :Cout]
    return jnp.transpose(out, (0, 3, 1, 2))                   # -> NCHW


# ----------------------------------------------------------------------------
# Pure-JAX reference (lax.conv, f32) for correctness check.
# ----------------------------------------------------------------------------
def _ref_bn(y_nchw, g, b):
    mean = jnp.mean(y_nchw, axis=(0, 2, 3), keepdims=True)
    var = jnp.mean((y_nchw - mean) ** 2, axis=(0, 2, 3), keepdims=True)
    return (y_nchw - mean) * jax.lax.rsqrt(var + BN_EPS) * g.reshape(1, -1, 1, 1) \
        + b.reshape(1, -1, 1, 1)


def ref_forward(x_nchw, params, stride):
    def conv(x, w_hwio, s, pad):
        w = jnp.transpose(w_hwio, (3, 2, 0, 1))   # -> OIHW
        return jax.lax.conv_general_dilated(
            x, w, (s, s), [(pad, pad), (pad, pad)],
            dimension_numbers=("NCHW", "OIHW", "NCHW"))

    out = jnp.maximum(_ref_bn(conv(x_nchw, params["w1"], stride, 1),
                              params["g1"], params["b1"]), 0.0)
    out = _ref_bn(conv(out, params["w2"], 1, 1), params["g2"], params["b2"])
    identity = x_nchw
    if "wd" in params:
        identity = _ref_bn(conv(x_nchw, params["wd"], stride, 0),
                           params["gd"], params["bd"])
    return jnp.maximum(out + identity, 0.0)


if __name__ == "__main__":
    key = jax.random.PRNGKey(0)
    k_x, k_p = jax.random.split(key)

    in_channels, out_channels, stride = 4, 8, 2
    x = jax.random.normal(k_x, (2, in_channels, 16, 16), jnp.float32)   # NCHW
    params = init_params(k_p, in_channels, out_channels, stride)

    fwd = jax.jit(functools.partial(resnet_block_forward, stride=stride))
    out = jax.block_until_ready(fwd(x, params))

    ref = jax.block_until_ready(ref_forward(x, params, stride))
    assert out.shape == ref.shape == (2, out_channels, 8, 8)
    # Matmul inputs and intermediate activations are intentionally bf16 (MXU-native),
    # so the tolerance is relaxed vs. the pure-f32 reference.
    assert jnp.allclose(out, ref, rtol=3e-2, atol=3e-2), "mismatch vs reference"

    print("KERNEL_OK")
</pallas_src>

<mosaic_0001>
module attributes {stable_mosaic.version = 11 : i64} {
  func.func @_conv3x3_kernel(%arg0: i32, %arg1: memref<1x10x10x128xbf16, #tpu.memory_space<vmem>>, %arg2: memref<3x384x128xbf16, #tpu.memory_space<vmem>>, %arg3: memref<1x8x8x128xf32, #tpu.memory_space<vmem>>, %arg4: memref<1x2x128xf32, #tpu.memory_space<vmem>>) attributes {dimension_semantics = [#tpu.dimension_semantics<parallel>], iteration_bounds = array<i64: 2>, scalar_prefetch = 0 : i64, scratch_operands = 0 : i64, tpu.core_type = #tpu.core_type<tc>, window_params = [{transform_indices = @transform_0, window_bounds = array<i64: 1, 10, 10, 128>}, {pipeline_mode = #tpu.pipeline_mode<synchronous>, transform_indices = @transform_1, window_bounds = array<i64: 3, 384, 128>}, {transform_indices = @transform_2, window_bounds = array<i64: 1, 8, 8, 128>}, {transform_indices = @transform_3, window_bounds = array<i64: 1, 2, 128>}]} {
    %cst = arith.constant 0.000000e+00 : f32
    %0 = vector.broadcast %cst : f32 to vector<64x128xf32>
    %c0 = arith.constant 0 : index
    %c0_0 = arith.constant 0 : index
    %c0_1 = arith.constant 0 : index
    %c0_2 = arith.constant 0 : index
    %1 = vector.load %arg1[%c0, %c0_0, %c0_1, %c0_2] : memref<1x10x10x128xbf16, #tpu.memory_space<vmem>>, vector<1x8x8x128xbf16>
    %2 = vector.shape_cast %1 : vector<1x8x8x128xbf16> to vector<8x8x128xbf16>
    %c0_3 = arith.constant 0 : index
    %c0_4 = arith.constant 0 : index
    %c1 = arith.constant 1 : index
    %c0_5 = arith.constant 0 : index
    %3 = vector.load %arg1[%c0_3, %c0_4, %c1, %c0_5] : memref<1x10x10x128xbf16, #tpu.memory_space<vmem>>, vector<1x8x8x128xbf16>
    %4 = vector.shape_cast %3 : vector<1x8x8x128xbf16> to vector<8x8x128xbf16>
    %c0_6 = arith.constant 0 : index
    %c0_7 = arith.constant 0 : index
    %c2 = arith.constant 2 : index
    %c0_8 = arith.constant 0 : index
    %5 = vector.load %arg1[%c0_6, %c0_7, %c2, %c0_8] : memref<1x10x10x128xbf16, #tpu.memory_space<vmem>>, vector<1x8x8x128xbf16>
    %6 = vector.shape_cast %5 : vector<1x8x8x128xbf16> to vector<8x8x128xbf16>
    %7 = tpu.concatenate %2, %4, %6 in 2 : vector<8x8x128xbf16>, vector<8x8x128xbf16>, vector<8x8x128xbf16> -> vector<8x8x384xbf16>
    %8 = vector.shape_cast %7 : vector<8x8x384xbf16> to vector<64x384xbf16>
    %c0_9 = arith.constant 0 : index
    %c0_10 = arith.constant 0 : index
    %c0_11 = arith.constant 0 : index
    %9 = vector.load %arg2[%c0_9, %c0_10, %c0_11] : memref<3x384x128xbf16, #tpu.memory_space<vmem>>, vector<1x384x128xbf16>
    %10 = vector.shape_cast %9 : vector<1x384x128xbf16> to vector<384x128xbf16>
    %cst_12 = arith.constant dense<0.000000e+00> : vector<64x128xf32>
    %11 = tpu.matmul %8, %10, %cst_12 {dimension_numbers = #tpu.dot_dimension_numbers<[1], [0], [0], [1], [0, 0, 1, 1], [], []>} : vector<64x384xbf16>, vector<384x128xbf16>, vector<64x128xf32> -> vector<64x128xf32>
    %12 = arith.addf %0, %11 : vector<64x128xf32>
    %c0_13 = arith.constant 0 : index
    %c1_14 = arith.constant 1 : index
    %c0_15 = arith.constant 0 : index
    %c0_16 = arith.constant 0 : index
    %13 = vector.load %arg1[%c0_13, %c1_14, %c0_15, %c0_16] : memref<1x10x10x128xbf16, #tpu.memory_space<vmem>>, vector<1x8x8x128xbf16>
    %14 = vector.shape_cast %13 : vector<1x8x8x128xbf16> to vector<8x8x128xbf16>
    %c0_17 = arith.constant 0 : index
    %c1_18 = arith.constant 1 : index
    %c1_19 = arith.constant 1 : index
    %c0_20 = arith.constant 0 : index
    %15 = vector.load %arg1[%c0_17, %c1_18, %c1_19, %c0_20] : memref<1x10x10x128xbf16, #tpu.memory_space<vmem>>, vector<1x8x8x128xbf16>
    %16 = vector.shape_cast %15 : vector<1x8x8x128xbf16> to vector<8x8x128xbf16>
    %c0_21 = arith.constant 0 : index
    %c1_22 = arith.constant 1 : index
    %c2_23 = arith.constant 2 : index
    %c0_24 = arith.constant 0 : index
    %17 = vector.load %arg1[%c0_21, %c1_22, %c2_23, %c0_24] : memref<1x10x10x128xbf16, #tpu.memory_space<vmem>>, vector<1x8x8x128xbf16>
    %18 = vector.shape_cast %17 : vector<1x8x8x128xbf16> to vector<8x8x128xbf16>
    %19 = tpu.concatenate %14, %16, %18 in 2 : vector<8x8x128xbf16>, vector<8x8x128xbf16>, vector<8x8x128xbf16> -> vector<8x8x384xbf16>
    %20 = vector.shape_cast %19 : vector<8x8x384xbf16> to vector<64x384xbf16>
    %c1_25 = arith.constant 1 : index
    %c0_26 = arith.constant 0 : index
    %c0_27 = arith.constant 0 : index
    %21 = vector.load %arg2[%c1_25, %c0_26, %c0_27] : memref<3x384x128xbf16, #tpu.memory_space<vmem>>, vector<1x384x128xbf16>
    %22 = vector.shape_cast %21 : vector<1x384x128xbf16> to vector<384x128xbf16>
    %cst_28 = arith.constant dense<0.000000e+00> : vector<64x128xf32>
    %23 = tpu.matmul %20, %22, %cst_28 {dimension_numbers = #tpu.dot_dimension_numbers<[1], [0], [0], [1], [0, 0, 1, 1], [], []>} : vector<64x384xbf16>, vector<384x128xbf16>, vector<64x128xf32> -> vector<64x128xf32>
    %24 = arith.addf %12, %23 : vector<64x128xf32>
    %c0_29 = arith.constant 0 : index
    %c2_30 = arith.constant 2 : index
    %c0_31 = arith.constant 0 : index
    %c0_32 = arith.constant 0 : index
    %25 = vector.load %arg1[%c0_29, %c2_30, %c0_31, %c0_32] : memref<1x10x10x128xbf16, #tpu.memory_space<vmem>>, vector<1x8x8x128xbf16>
    %26 = vector.shape_cast %25 : vector<1x8x8x128xbf16> to vector<8x8x128xbf16>
    %c0_33 = arith.constant 0 : index
    %c2_34 = arith.constant 2 : index
    %c1_35 = arith.constant 1 : index
    %c0_36 = arith.constant 0 : index
    %27 = vector.load %arg1[%c0_33, %c2_34, %c1_35, %c0_36] : memref<1x10x10x128xbf16, #tpu.memory_space<vmem>>, vector<1x8x8x128xbf16>
    %28 = vector.shape_cast %27 : vector<1x8x8x128xbf16> to vector<8x8x128xbf16>
    %c0_37 = arith.constant 0 : index
    %c2_38 = arith.constant 2 : index
    %c2_39 = arith.constant 2 : index
    %c0_40 = arith.constant 0 : index
    %29 = vector.load %arg1[%c0_37, %c2_38, %c2_39, %c0_40] : memref<1x10x10x128xbf16, #tpu.memory_space<vmem>>, vector<1x8x8x128xbf16>
    %30 = vector.shape_cast %29 : vector<1x8x8x128xbf16> to vector<8x8x128xbf16>
    %31 = tpu.concatenate %26, %28, %30 in 2 : vector<8x8x128xbf16>, vector<8x8x128xbf16>, vector<8x8x128xbf16> -> vector<8x8x384xbf16>
    %32 = vector.shape_cast %31 : vector<8x8x384xbf16> to vector<64x384xbf16>
    %c2_41 = arith.constant 2 : index
    %c0_42 = arith.constant 0 : index
    %c0_43 = arith.constant 0 : index
    %33 = vector.load %arg2[%c2_41, %c0_42, %c0_43] : memref<3x384x128xbf16, #tpu.memory_space<vmem>>, vector<1x384x128xbf16>
    %34 = vector.shape_cast %33 : vector<1x384x128xbf16> to vector<384x128xbf16>
    %cst_44 = arith.constant dense<0.000000e+00> : vector<64x128xf32>
    %35 = tpu.matmul %32, %34, %cst_44 {dimension_numbers = #tpu.dot_dimension_numbers<[1], [0], [0], [1], [0, 0, 1, 1], [], []>} : vector<64x384xbf16>, vector<384x128xbf16>, vector<64x128xf32> -> vector<64x128xf32>
    %36 = arith.addf %24, %35 : vector<64x128xf32>
    %37 = vector.shape_cast %36 : vector<64x128xf32> to vector<8x8x128xf32>
    %c0_45 = arith.constant 0 : index
    %c0_46 = arith.constant 0 : index
    %c0_47 = arith.constant 0 : index
    %c0_48 = arith.constant 0 : index
    %38 = vector.load %arg3[%c0_45, %c0_46, %c0_47, %c0_48] : memref<1x8x8x128xf32, #tpu.memory_space<vmem>>, vector<1x8x8x128xf32>
    %39 = vector.shape_cast %38 : vector<1x8x8x128xf32> to vector<8x8x128xf32>
    %40 = vector.shape_cast %37 : vector<8x8x128xf32> to vector<1x8x8x128xf32>
    tpu.vector_store %arg3[%c0_45, %c0_46, %c0_47, %c0_48], %40 {strides = array<i32>} : memref<1x8x8x128xf32, #tpu.memory_space<vmem>>, vector<1x8x8x128xf32>,
    %cst_49 = arith.constant dense<0.000000e+00> : vector<128xf32>
    %41 = vector.multi_reduction <add>, %36, %cst_49 [0] : vector<64x128xf32> to vector<128xf32>
    %42 = vector.shape_cast %41 : vector<128xf32> to vector<1x128xf32>
    %c0_50 = arith.constant 0 : index
    %c0_51 = arith.constant 0 : index
    %c0_52 = arith.constant 0 : index
    %43 = vector.load %arg4[%c0_50, %c0_51, %c0_52] : memref<1x2x128xf32, #tpu.memory_space<vmem>>, vector<1x1x128xf32>
    %44 = vector.shape_cast %43 : vector<1x1x128xf32> to vector<1x128xf32>
    %45 = vector.shape_cast %42 : vector<1x128xf32> to vector<1x1x128xf32>
    tpu.vector_store %arg4[%c0_50, %c0_51, %c0_52], %45 {strides = array<i32>} : memref<1x2x128xf32, #tpu.memory_space<vmem>>, vector<1x1x128xf32>,
    %46 = arith.mulf %36, %36 : vector<64x128xf32>
    %cst_53 = arith.constant dense<0.000000e+00> : vector<128xf32>
    %47 = vector.multi_reduction <add>, %46, %cst_53 [0] : vector<64x128xf32> to vector<128xf32>
    %48 = vector.shape_cast %47 : vector<128xf32> to vector<1x128xf32>
    %c0_54 = arith.constant 0 : index
    %c1_55 = arith.constant 1 : index
    %c0_56 = arith.constant 0 : index
    %49 = vector.load %arg4[%c0_54, %c1_55, %c0_56] : memref<1x2x128xf32, #tpu.memory_space<vmem>>, vector<1x1x128xf32>
    %50 = vector.shape_cast %49 : vector<1x1x128xf32> to vector<1x128xf32>
    %51 = vector.shape_cast %48 : vector<1x128xf32> to vector<1x1x128xf32>
    tpu.vector_store %arg4[%c0_54, %c1_55, %c0_56], %51 {strides = array<i32>} : memref<1x2x128xf32, #tpu.memory_space<vmem>>, vector<1x1x128xf32>,
    return
  }
  func.func @transform_0(%arg0: i32) -> (i32, i32, i32, i32) {
    %c0_i32 = arith.constant 0 : i32
    %c0_i32_0 = arith.constant 0 : i32
    %c0_i32_1 = arith.constant 0 : i32
    %c0_i32_2 = arith.constant 0 : i32
    return %arg0, %c0_i32, %c0_i32_0, %c0_i32_1 : i32, i32, i32, i32
  }
  func.func @transform_1(%arg0: i32) -> (i32, i32, i32) {
    %c0_i32 = arith.constant 0 : i32
    %c0_i32_0 = arith.constant 0 : i32
    %c0_i32_1 = arith.constant 0 : i32
    %c0_i32_2 = arith.constant 0 : i32
    return %c0_i32, %c0_i32_0, %c0_i32_1 : i32, i32, i32
  }
  func.func @transform_2(%arg0: i32) -> (i32, i32, i32, i32) {
    %c0_i32 = arith.constant 0 : i32
    %c0_i32_0 = arith.constant 0 : i32
    %c0_i32_1 = arith.constant 0 : i32
    %c0_i32_2 = arith.constant 0 : i32
    return %arg0, %c0_i32, %c0_i32_0, %c0_i32_1 : i32, i32, i32, i32
  }
  func.func @transform_3(%arg0: i32) -> (i32, i32, i32) {
    %c0_i32 = arith.constant 0 : i32
    %c0_i32_0 = arith.constant 0 : i32
    %c0_i32_1 = arith.constant 0 : i32
    return %arg0, %c0_i32, %c0_i32_0 : i32, i32, i32
  }
}

module attributes {stable_mosaic.version = 11 : i64} {
  func.func @_mm_stats_kernel(%arg0: i32, %arg1: i32, %arg2: i32, %arg3: memref<128x128xbf16, #tpu.memory_space<vmem>>, %arg4: memref<128x256xbf16, #tpu.memory_space<vmem>>, %arg5: memref<128x256xbf16, #tpu.memory_space<vmem>>, %arg6: memref<1x2x256xf32, #tpu.memory_space<vmem>>, %arg7: memref<128x256xf32, #tpu.memory_space<vmem>>) attributes {dimension_semantics = [#tpu.dimension_semantics<parallel>, #tpu.dimension_semantics<parallel>, #tpu.dimension_semantics<arbitrary>], iteration_bounds = array<i64: 1, 1, 1>, scalar_prefetch = 0 : i64, scratch_operands = 1 : i64, tpu.core_type = #tpu.core_type<tc>, window_params = [{transform_indices = @transform_0, window_bounds = array<i64: 128, 128>}, {transform_indices = @transform_1, window_bounds = array<i64: 128, 256>}, {transform_indices = @transform_2, window_bounds = array<i64: 128, 256>}, {transform_indices = @transform_3, window_bounds = array<i64: 1, 2, 256>}]} {
    %c0_i32 = arith.constant 0 : i32
    %0 = arith.cmpi eq, %arg2, %c0_i32 : i32
    %1 = arith.extui %0 : i1 to i32
    %c0_i32_0 = arith.constant 0 : i32
    %2 = arith.cmpi ne, %1, %c0_i32_0 : i32
    scf.if %2 {
      %cst_10 = arith.constant 0.000000e+00 : f32
      %12 = vector.broadcast %cst_10 : f32 to vector<128x256xf32>
      %c0_11 = arith.constant 0 : index
      %c0_12 = arith.constant 0 : index
      %13 = vector.load %arg7[%c0_11, %c0_12] : memref<128x256xf32, #tpu.memory_space<vmem>>, vector<128x256xf32>
      tpu.vector_store %arg7[%c0_11, %c0_12], %12 {strides = array<i32>} : memref<128x256xf32, #tpu.memory_space<vmem>>, vector<128x256xf32>,
    } else {
    }
    %c0 = arith.constant 0 : index
    %c0_1 = arith.constant 0 : index
    %3 = vector.load %arg7[%c0, %c0_1] : memref<128x256xf32, #tpu.memory_space<vmem>>, vector<128x256xf32>
    %c0_2 = arith.constant 0 : index
    %c0_3 = arith.constant 0 : index
    %4 = vector.load %arg3[%c0_2, %c0_3] : memref<128x128xbf16, #tpu.memory_space<vmem>>, vector<128x128xbf16>
    %c0_4 = arith.constant 0 : index
    %c0_5 = arith.constant 0 : index
    %5 = vector.load %arg4[%c0_4, %c0_5] : memref<128x256xbf16, #tpu.memory_space<vmem>>, vector<128x256xbf16>
    %cst = arith.constant dense<0.000000e+00> : vector<128x256xf32>
    %6 = tpu.matmul %4, %5, %cst {dimension_numbers = #tpu.dot_dimension_numbers<[1], [0], [0], [1], [0, 0, 1, 1], [], []>} : vector<128x128xbf16>, vector<128x256xbf16>, vector<128x256xf32> -> vector<128x256xf32>
    %7 = arith.addf %3, %6 : vector<128x256xf32>
    %c0_6 = arith.constant 0 : index
    %c0_7 = arith.constant 0 : index
    %8 = vector.load %arg7[%c0_6, %c0_7] : memref<128x256xf32, #tpu.memory_space<vmem>>, vector<128x256xf32>
    tpu.vector_store %arg7[%c0_6, %c0_7], %7 {strides = array<i32>} : memref<128x256xf32, #tpu.memory_space<vmem>>, vector<128x256xf32>,
    %c0_i32_8 = arith.constant 0 : i32
    %9 = arith.cmpi eq, %arg2, %c0_i32_8 : i32
    %10 = arith.extui %9 : i1 to i32
    %c0_i32_9 = arith.constant 0 : i32
    %11 = arith.cmpi ne, %10, %c0_i32_9 : i32
    scf.if %11 {
      %c0_10 = arith.constant 0 : index
      %c0_11 = arith.constant 0 : index
      %12 = vector.load %arg7[%c0_10, %c0_11] : memref<128x256xf32, #tpu.memory_space<vmem>>, vector<128x256xf32>
      %13 = arith.truncf %12 : vector<128x256xf32> to vector<128x256xbf16>
      %c0_12 = arith.constant 0 : index
      %c0_13 = arith.constant 0 : index
      %14 = vector.load %arg5[%c0_12, %c0_13] : memref<128x256xbf16, #tpu.memory_space<vmem>>, vector<128x256xbf16>
      tpu.vector_store %arg5[%c0_12, %c0_13], %13 {strides = array<i32>} : memref<128x256xbf16, #tpu.memory_space<vmem>>, vector<128x256xbf16>,
      %cst_14 = arith.constant dense<0.000000e+00> : vector<256xf32>
      %15 = vector.multi_reduction <add>, %12, %cst_14 [0] : vector<128x256xf32> to vector<256xf32>
      %16 = vector.shape_cast %15 : vector<256xf32> to vector<1x256xf32>
      %c0_15 = arith.constant 0 : index
      %c0_16 = arith.constant 0 : index
      %c0_17 = arith.constant 0 : index
      %17 = vector.load %arg6[%c0_15, %c0_16, %c0_17] : memref<1x2x256xf32, #tpu.memory_space<vmem>>, vector<1x1x256xf32>
      %18 = vector.shape_cast %17 : vector<1x1x256xf32> to vector<1x256xf32>
      %19 = vector.shape_cast %16 : vector<1x256xf32> to vector<1x1x256xf32>
      tpu.vector_store %arg6[%c0_15, %c0_16, %c0_17], %19 {strides = array<i32>} : memref<1x2x256xf32, #tpu.memory_space<vmem>>, vector<1x1x256xf32>,
      %20 = arith.mulf %12, %12 : vector<128x256xf32>
      %cst_18 = arith.constant dense<0.000000e+00> : vector<256xf32>
      %21 = vector.multi_reduction <add>, %20, %cst_18 [0] : vector<128x256xf32> to vector<256xf32>
      %22 = vector.shape_cast %21 : vector<256xf32> to vector<1x256xf32>
      %c0_19 = arith.constant 0 : index
      %c1 = arith.constant 1 : index
      %c0_20 = arith.constant 0 : index
      %23 = vector.load %arg6[%c0_19, %c1, %c0_20] : memref<1x2x256xf32, #tpu.memory_space<vmem>>, vector<1x1x256xf32>
      %24 = vector.shape_cast %23 : vector<1x1x256xf32> to vector<1x256xf32>
      %25 = vector.shape_cast %22 : vector<1x256xf32> to vector<1x1x256xf32>
      tpu.vector_store %arg6[%c0_19, %c1, %c0_20], %25 {strides = array<i32>} : memref<1x2x256xf32, #tpu.memory_space<vmem>>, vector<1x1x256xf32>,
    } else {
    }
    return
  }
  func.func @transform_0(%arg0: i32, %arg1: i32, %arg2: i32) -> (i32, i32) {
    %c0_i32 = arith.constant 0 : i32
    return %arg0, %arg2 : i32, i32
  }
  func.func @transform_1(%arg0: i32, %arg1: i32, %arg2: i32) -> (i32, i32) {
    %c0_i32 = arith.constant 0 : i32
    return %arg2, %arg1 : i32, i32
  }
  func.func @transform_2(%arg0: i32, %arg1: i32, %arg2: i32) -> (i32, i32) {
    %c0_i32 = arith.constant 0 : i32
    return %arg0, %arg1 : i32, i32
  }
  func.func @transform_3(%arg0: i32, %arg1: i32, %arg2: i32) -> (i32, i32, i32) {
    %c0_i32 = arith.constant 0 : i32
    %c0_i32_0 = arith.constant 0 : i32
    return %arg0, %c0_i32, %arg1 : i32, i32, i32
  }
}

module attributes {stable_mosaic.version = 11 : i64} {
  func.func @_bn_add_relu_kernel(%arg0: i32, %arg1: memref<128x128xf32, #tpu.memory_space<vmem>>, %arg2: memref<128x128xbf16, #tpu.memory_space<vmem>>, %arg3: memref<1x128xf32, #tpu.memory_space<vmem>>, %arg4: memref<1x128xf32, #tpu.memory_space<vmem>>, %arg5: memref<1x128xf32, #tpu.memory_space<vmem>>, %arg6: memref<1x128xf32, #tpu.memory_space<vmem>>, %arg7: memref<128x128xf32, #tpu.memory_space<vmem>>) attributes {dimension_semantics = [#tpu.dimension_semantics<parallel>], iteration_bounds = array<i64: 1>, scalar_prefetch = 0 : i64, scratch_operands = 0 : i64, tpu.core_type = #tpu.core_type<tc>, window_params = [{transform_indices = @transform_0, window_bounds = array<i64: 128, 128>}, {transform_indices = @transform_1, window_bounds = array<i64: 128, 128>}, {pipeline_mode = #tpu.pipeline_mode<synchronous>, transform_indices = @transform_2, window_bounds = array<i64: 1, 128>}, {pipeline_mode = #tpu.pipeline_mode<synchronous>, transform_indices = @transform_3, window_bounds = array<i64: 1, 128>}, {pipeline_mode = #tpu.pipeline_mode<synchronous>, transform_indices = @transform_4, window_bounds = array<i64: 1, 128>}, {pipeline_mode = #tpu.pipeline_mode<synchronous>, transform_indices = @transform_5, window_bounds = array<i64: 1, 128>}, {transform_indices = @transform_6, window_bounds = array<i64: 128, 128>}]} {
    %c0 = arith.constant 0 : index
    %c0_0 = arith.constant 0 : index
    %0 = vector.load %arg1[%c0, %c0_0] : memref<128x128xf32, #tpu.memory_space<vmem>>, vector<128x128xf32>
    %c0_1 = arith.constant 0 : index
    %c0_2 = arith.constant 0 : index
    %1 = vector.load %arg3[%c0_1, %c0_2] : memref<1x128xf32, #tpu.memory_space<vmem>>, vector<1x128xf32>
    %2 = vector.broadcast %1 : vector<1x128xf32> to vector<128x128xf32>
    %3 = arith.mulf %0, %2 : vector<128x128xf32>
    %c0_3 = arith.constant 0 : index
    %c0_4 = arith.constant 0 : index
    %4 = vector.load %arg4[%c0_3, %c0_4] : memref<1x128xf32, #tpu.memory_space<vmem>>, vector<1x128xf32>
    %5 = vector.broadcast %4 : vector<1x128xf32> to vector<128x128xf32>
    %6 = arith.addf %3, %5 : vector<128x128xf32>
    %c0_5 = arith.constant 0 : index
    %c0_6 = arith.constant 0 : index
    %7 = vector.load %arg2[%c0_5, %c0_6] : memref<128x128xbf16, #tpu.memory_space<vmem>>, vector<128x128xbf16>
    %8 = arith.extf %7 : vector<128x128xbf16> to vector<128x128xf32>
    %c0_7 = arith.constant 0 : index
    %c0_8 = arith.constant 0 : index
    %9 = vector.load %arg5[%c0_7, %c0_8] : memref<1x128xf32, #tpu.memory_space<vmem>>, vector<1x128xf32>
    %10 = vector.broadcast %9 : vector<1x128xf32> to vector<128x128xf32>
    %11 = arith.mulf %8, %10 : vector<128x128xf32>
    %12 = arith.addf %6, %11 : vector<128x128xf32>
    %c0_9 = arith.constant 0 : index
    %c0_10 = arith.constant 0 : index
    %13 = vector.load %arg6[%c0_9, %c0_10] : memref<1x128xf32, #tpu.memory_space<vmem>>, vector<1x128xf32>
    %14 = vector.broadcast %13 : vector<1x128xf32> to vector<128x128xf32>
    %15 = arith.addf %12, %14 : vector<128x128xf32>
    %cst = arith.constant 0.000000e+00 : f32
    %16 = vector.broadcast %cst : f32 to vector<128x128xf32>
    %17 = arith.maximumf %15, %16 : vector<128x128xf32>
    %c0_11 = arith.constant 0 : index
    %c0_12 = arith.constant 0 : index
    %18 = vector.load %arg7[%c0_11, %c0_12] : memref<128x128xf32, #tpu.memory_space<vmem>>, vector<128x128xf32>
    tpu.vector_store %arg7[%c0_11, %c0_12], %17 {strides = array<i32>} : memref<128x128xf32, #tpu.memory_space<vmem>>, vector<128x128xf32>,
    return
  }
  func.func @transform_0(%arg0: i32) -> (i32, i32) {
    %c0_i32 = arith.constant 0 : i32
    %c0_i32_0 = arith.constant 0 : i32
    return %arg0, %c0_i32 : i32, i32
  }
  func.func @transform_1(%arg0: i32) -> (i32, i32) {
    %c0_i32 = arith.constant 0 : i32
    %c0_i32_0 = arith.constant 0 : i32
    return %arg0, %c0_i32 : i32, i32
  }
  func.func @transform_2(%arg0: i32) -> (i32, i32) {
    %c0_i32 = arith.constant 0 : i32
    %c0_i32_0 = arith.constant 0 : i32
    %c0_i32_1 = arith.constant 0 : i32
    return %c0_i32, %c0_i32_0 : i32, i32
  }
  func.func @transform_3(%arg0: i32) -> (i32, i32) {
    %c0_i32 = arith.constant 0 : i32
    %c0_i32_0 = arith.constant 0 : i32
    %c0_i32_1 = arith.constant 0 : i32
    return %c0_i32, %c0_i32_0 : i32, i32
  }
  func.func @transform_4(%arg0: i32) -> (i32, i32) {
    %c0_i32 = arith.constant 0 : i32
    %c0_i32_0 = arith.constant 0 : i32
    %c0_i32_1 = arith.constant 0 : i32
    return %c0_i32, %c0_i32_0 : i32, i32
  }
  func.func @transform_5(%arg0: i32) -> (i32, i32) {
    %c0_i32 = arith.constant 0 : i32
    %c0_i32_0 = arith.constant 0 : i32
    %c0_i32_1 = arith.constant 0 : i32
    return %c0_i32, %c0_i32_0 : i32, i32
  }
  func.func @transform_6(%arg0: i32) -> (i32, i32) {
    %c0_i32 = arith.constant 0 : i32
    %c0_i32_0 = arith.constant 0 : i32
    return %arg0, %c0_i32 : i32, i32
  }
}

</mosaic_0001>

<bundles_post_ra>
// kernel: resnet_block_forward.5
= control target key start
LH: loop header
LB: loop body
LE: loop exit
PB: predicated region body
PF: predicated region fallthrough
CT: control target
= control target key end

     0   :  { %s497_s0 = inlined_call_operand.vmem [shape: f32[128,128], index: 0, kind: input, shape index: {}]   ;;  %s498_s1 = inlined_call_operand.vmem [shape: bf16[128,128], index: 1, kind: input, shape index: {}]   ;;  %s499_s2 = inlined_call_operand.vmem [shape: f32[1,128], index: 2, kind: input, shape index: {}]   ;;  %s500_s3 = inlined_call_operand.vmem [shape: f32[1,128], index: 3, kind: input, shape index: {}]   ;;  %s501_s4 = inlined_call_operand.vmem [shape: f32[1,128], index: 4, kind: input, shape index: {}]   ;;  %s502_s5 = inlined_call_operand.vmem [shape: f32[1,128], index: 5, kind: input, shape index: {}]   ;;  %s503_s6 = inlined_call_operand.vmem [shape: f32[128,128], index: 6, kind: output, shape index: {}]  }
   0x1   :  { %v23_v0 = vld [vmem:[%s497_s0] sm:$0xff]  ;;  %v24_v7 = vld [vmem:[%s497_s0 + $0x8] sm:$0xff]  ;;  %v25_v9 = vld [vmem:[%s497_s0 + $0x10] sm:$0xff] }
   0x2   :  { %v299_v1 = vld [vmem:[%s499_s2] ss:$0 sm:$0xff]  ;;  %v251_v10 = vld [vmem:[%s498_s1 + $0x8] sm:$0xff]   ;;  %v26_v15 = vld [vmem:[%s497_s0 + $0x18] sm:$0xff] }
   0x3   :  { %v304_v2 = vld [vmem:[%s500_s3] ss:$0 sm:$0xff]  ;;  %v46_v3 = vmul.f32 %v299_v1, %v23_v0  ;;  %v47_v12 = vmul.f32 %v299_v1, %v24_v7  ;;  %v48_v13 = vmul.f32 %v299_v1, %v25_v9  ;;  %v225_v14 = vunpack.c.l.bf16 %v251_v10  ;;  %v252_v17 = vld [vmem:[%s498_s1 + $0x10] sm:$0xff]   ;;  %v28_v22 = vld [vmem:[%s497_s0 + $0x28] sm:$0xff] }
   0x4   :  { %v220_v4 = vld [vmem:[%s498_s1] sm:$0xff]   ;;  %v49_v20 = vmul.f32 %v299_v1, %v26_v15  ;;  %v226_v21 = vunpack.c.h.bf16 %v251_v10  ;;  %v229_v31 = vunpack.c.l.bf16 %v252_v17  ;;  %v29_v32 = vld [vmem:[%s497_s0 + $0x30] sm:$0xff]  ;;  %v51_v36 = vmul.f32 %v299_v1, %v28_v22  ;;  %v253_v41 = vld [vmem:[%s498_s1 + $0x18] sm:$0xff]  }
   0x5   :  { %v313_v5 = vld [vmem:[%s501_s4] ss:$0 sm:$0xff]  ;;  %v221_v6 = vunpack.c.l.bf16 %v220_v4  ;;  %v222_v8 = vunpack.c.h.bf16 %v220_v4  ;;  %v69_v11 = vadd.f32 %v304_v2, %v46_v3  ;;  %v70_v24 = vadd.f32 %v304_v2, %v47_v12  ;;  %v30_v46 = vld [vmem:[%s497_s0 + $0x38] sm:$0xff]  ;;  %v32_v57 = vld [vmem:[%s497_s0 + $0x48] sm:$0xff] }
   0x6   :  { %v27_v16 = vld [vmem:[%s497_s0 + $0x20] sm:$0xff]  ;;  %v71_v25 = vadd.f32 %v304_v2, %v48_v13  ;;  %v126_v26 = vmul.f32 %v225_v14, %v313_v5  ;;  %v72_v29 = vadd.f32 %v304_v2, %v49_v20  ;;  %v127_v30 = vmul.f32 %v226_v21, %v313_v5  ;;  %v33_v4 = vld [vmem:[%s497_s0 + $0x50] sm:$0xff]  ;;  %v255_v10 = vld [vmem:[%s498_s1 + $0x28] sm:$0xff]  }
   0x7   :  { %v124_v18 = vmul.f32 %v221_v6, %v313_v5  ;;  %v125_v19 = vmul.f32 %v222_v8, %v313_v5  ;;  %v345_v23 = vld [vmem:[%s502_s5] ss:$0 sm:$0xff]  ;;  %v50_v27 = vmul.f32 %v299_v1, %v27_v16  ;;  %v128_v39 = vmul.f32 %v229_v31, %v313_v5  ;;  %v34_v15 = vld [vmem:[%s497_s0 + $0x58] sm:$0xff] }
   0x8   :  { %v142_v34 = vadd.f32 %v126_v26, %v71_v25  ;;  %v143_v38 = vadd.f32 %v127_v30, %v72_v29  ;;  %v230_v40 = vunpack.c.h.bf16 %v252_v17  ;;  %v74_v44 = vadd.f32 %v304_v2, %v51_v36  ;;  %v31_v51 = vld [vmem:[%s497_s0 + $0x40] sm:$0xff]  ;;  %v256_v30 = vld [vmem:[%s498_s1 + $0x30] sm:$0xff]  }
   0x9   :  { %v140_v28 = vadd.f32 %v124_v18, %v69_v11  ;;  %v141_v33 = vadd.f32 %v125_v19, %v70_v24  ;;  %v73_v35 = vadd.f32 %v304_v2, %v50_v27  ;;  %v52_v45 = vmul.f32 %v299_v1, %v29_v32  ;;  %v254_v52 = vld [vmem:[%s498_s1 + $0x20] sm:$0xff]  }
   0xa   :  { %v165_v43 = vadd.f32 %v345_v23, %v142_v34  ;;  %v166_v48 = vadd.f32 %v345_v23, %v143_v38  ;;  %v129_v50 = vmul.f32 %v230_v40, %v313_v5  ;;  %v233_v56 = vunpack.c.l.bf16 %v253_v41  ;;  %v35_v25 = vld [vmem:[%s497_s0 + $0x60] sm:$0xff]  ;;  %v37_v40 = vld [vmem:[%s497_s0 + $0x70] sm:$0xff] }
   0xb   :  { %v163_v37 = vadd.f32 %v345_v23, %v140_v28  ;;  %v164_v42 = vadd.f32 %v345_v23, %v141_v33  ;;  %v144_v49 = vadd.f32 %v128_v39, %v73_v35  ;;  %v75_v55 = vadd.f32 %v304_v2, %v52_v45  ;;  %v36_v35 = vld [vmem:[%s497_s0 + $0x68] sm:$0xff]  ;;  %v257_v45 = vld [vmem:[%s498_s1 + $0x38] sm:$0xff]  }
   0xc   :  { %v181_v54 = vmax.f32 %v165_v43, 0.0  ;;  %v182_v58 = vmax.f32 %v166_v48, 0.0  ;;  %v145_v60 = vadd.f32 %v129_v50, %v74_v44  ;;  %v53_v61 = vmul.f32 %v299_v1, %v30_v46 }
   0xd   :  { %v179_v47 = vmax.f32 %v163_v37, 0.0  ;;  %v180_v53 = vmax.f32 %v164_v42, 0.0  ;;  %v167_v59 = vadd.f32 %v345_v23, %v144_v49  ;;  %v130_v62 = vmul.f32 %v233_v56, %v313_v5 }
   0xe   :  { %197 = vst [vmem:[%s503_s6 + $0x10] sm:$0xff] %v181_v54  ;;  %v234_v63 = vunpack.c.h.bf16 %v253_v41  ;;  %v54_v0 = vmul.f32 %v299_v1, %v31_v51  ;;  %v237_v3 = vunpack.c.l.bf16 %v254_v52  ;;  %198 = vst [vmem:[%s503_s6 + $0x18] sm:$0xff] %v182_v58  ;;  %v168_v7 = vadd.f32 %v345_v23, %v145_v60  ;;  %v38_v54 = vld [vmem:[%s497_s0 + $0x78] sm:$0xff] }
   0xf   :  { %195 = vst [vmem:[%s503_s6] sm:$0xff] %v179_v47  ;;  %196 = vst [vmem:[%s503_s6 + $0x8] sm:$0xff] %v180_v53  ;;  %v183_v6 = vmax.f32 %v167_v59, 0.0  ;;  %v76_v8 = vadd.f32 %v304_v2, %v53_v61  ;;  %v55_v9 = vmul.f32 %v299_v1, %v32_v57  ;;  %v146_v11 = vadd.f32 %v130_v62, %v75_v55 }
  0x10   :  { %v131_v12 = vmul.f32 %v234_v63, %v313_v5  ;;  %v77_v13 = vadd.f32 %v304_v2, %v54_v0  ;;  %v132_v14 = vmul.f32 %v237_v3, %v313_v5  ;;  %v184_v16 = vmax.f32 %v168_v7, 0.0 }
  0x11   :  { %199 = vst [vmem:[%s503_s6 + $0x20] sm:$0xff] %v183_v6  ;;  %v78_v17 = vadd.f32 %v304_v2, %v55_v9  ;;  %v238_v18 = vunpack.c.h.bf16 %v254_v52  ;;  %v56_v19 = vmul.f32 %v299_v1, %v33_v4  ;;  %v169_v20 = vadd.f32 %v345_v23, %v146_v11 }
  0x12   :  { %v147_v21 = vadd.f32 %v131_v12, %v76_v8  ;;  %v148_v22 = vadd.f32 %v132_v14, %v77_v13  ;;  %v241_v24 = vunpack.c.l.bf16 %v255_v10  ;;  %200 = vst [vmem:[%s503_s6 + $0x28] sm:$0xff] %v184_v16  ;;  %v57_v28 = vmul.f32 %v299_v1, %v34_v15 }
  0x13   :  { %v133_v26 = vmul.f32 %v238_v18, %v313_v5  ;;  %v79_v27 = vadd.f32 %v304_v2, %v56_v19  ;;  %v242_v29 = vunpack.c.h.bf16 %v255_v10  ;;  %v185_v31 = vmax.f32 %v169_v20, 0.0 }
  0x14   :  { %v170_v32 = vadd.f32 %v345_v23, %v147_v21  ;;  %v171_v33 = vadd.f32 %v345_v23, %v148_v22  ;;  %v134_v34 = vmul.f32 %v241_v24, %v313_v5  ;;  %v80_v37 = vadd.f32 %v304_v2, %v57_v28 }
  0x15   :  { %v149_v36 = vadd.f32 %v133_v26, %v78_v17  ;;  %v135_v38 = vmul.f32 %v242_v29, %v313_v5  ;;  %v58_v39 = vmul.f32 %v299_v1, %v35_v25  ;;  %201 = vst [vmem:[%s503_s6 + $0x30] sm:$0xff] %v185_v31  ;;  %v245_v44 = vunpack.c.l.bf16 %v256_v30 }
  0x16   :  { %v186_v41 = vmax.f32 %v170_v32, 0.0  ;;  %v187_v42 = vmax.f32 %v171_v33, 0.0  ;;  %v150_v43 = vadd.f32 %v134_v34, %v79_v27  ;;  %v59_v49 = vmul.f32 %v299_v1, %v36_v35 }
  0x17   :  { %v172_v46 = vadd.f32 %v345_v23, %v149_v36  ;;  %v151_v47 = vadd.f32 %v135_v38, %v80_v37  ;;  %v81_v48 = vadd.f32 %v304_v2, %v58_v39  ;;  %v136_v51 = vmul.f32 %v245_v44, %v313_v5 }
  0x18   :  { %202 = vst [vmem:[%s503_s6 + $0x38] sm:$0xff] %v186_v41  ;;  %203 = vst [vmem:[%s503_s6 + $0x40] sm:$0xff] %v187_v42  ;;  %v173_v50 = vadd.f32 %v345_v23, %v150_v43  ;;  %v246_v52 = vunpack.c.h.bf16 %v256_v30  ;;  %v60_v53 = vmul.f32 %v299_v1, %v37_v40  ;;  %v82_v57 = vadd.f32 %v304_v2, %v59_v49 }
  0x19   :  { %v188_v55 = vmax.f32 %v172_v46, 0.0  ;;  %v174_v56 = vadd.f32 %v345_v23, %v151_v47  ;;  %v249_v58 = vunpack.c.l.bf16 %v257_v45  ;;  %v152_v60 = vadd.f32 %v136_v51, %v81_v48 }
  0x1a   :  { %v189_v59 = vmax.f32 %v173_v50, 0.0  ;;  %v137_v61 = vmul.f32 %v246_v52, %v313_v5  ;;  %v83_v62 = vadd.f32 %v304_v2, %v60_v53  ;;  %v61_v3 = vmul.f32 %v299_v1, %v38_v54 }
  0x1b   :  { %204 = vst [vmem:[%s503_s6 + $0x48] sm:$0xff] %v188_v55  ;;  %v190_v63 = vmax.f32 %v174_v56, 0.0  ;;  %v138_v0 = vmul.f32 %v249_v58, %v313_v5  ;;  %v250_v4 = vunpack.c.h.bf16 %v257_v45  ;;  %v175_v6 = vadd.f32 %v345_v23, %v152_v60 }
  0x1c   :  { %205 = vst [vmem:[%s503_s6 + $0x50] sm:$0xff] %v189_v59  ;;  %v153_v7 = vadd.f32 %v137_v61, %v82_v57  ;;  %v84_v9 = vadd.f32 %v304_v2, %v61_v3 }
  0x1d   :  { %206 = vst [vmem:[%s503_s6 + $0x58] sm:$0xff] %v190_v63  ;;  %v154_v8 = vadd.f32 %v138_v0, %v83_v62  ;;  %v139_v10 = vmul.f32 %v250_v4, %v313_v5  ;;  %v191_v11 = vmax.f32 %v175_v6, 0.0 }
  0x1e   :  { %v176_v1 = vadd.f32 %v345_v23, %v153_v7 }
  0x1f   :  { %v177_v12 = vadd.f32 %v345_v23, %v154_v8  ;;  %v155_v13 = vadd.f32 %v139_v10, %v84_v9  ;;  %207 = vst [vmem:[%s503_s6 + $0x60] sm:$0xff] %v191_v11 }
  0x20   :  { %v192_v14 = vmax.f32 %v176_v1, 0.0 }
  0x21   :  { %v193_v15 = vmax.f32 %v177_v12, 0.0  ;;  %v178_v16 = vadd.f32 %v345_v23, %v155_v13 }
  0x22   :  { %208 = vst [vmem:[%s503_s6 + $0x68] sm:$0xff] %v192_v14 }
  0x23   :  { %209 = vst [vmem:[%s503_s6 + $0x70] sm:$0xff] %v193_v15  ;;  %v194_v2 = vmax.f32 %v178_v16, 0.0 }
  0x25   :  { %210 = vst [vmem:[%s503_s6 + $0x78] sm:$0xff] %v194_v2 }

// kernel: resnet_block_forward.3
= control target key start
LH: loop header
LB: loop body
LE: loop exit
PB: predicated region body
PF: predicated region fallthrough
CT: control target
= control target key end

     0   :  { %v840_v1 = vmov 0   ;;  %s1074_s1 = inlined_call_operand.vmem [shape: bf16[128,256], index: 1, kind: input, shape index: {}]   ;;  %s1075_s0 = inlined_call_operand.vmem [shape: bf16[128,128], index: 0, kind: input, shape index: {}]   ;;  %s1076_s2 = inlined_call_operand.vmem [shape: bf16[128,256], index: 2, kind: output, shape index: {0}]   ;;  %s1077_s3 = inlined_call_operand.vmem [shape: f32[1,2,256], index: 3, kind: output, shape index: {1}]  }
   0x1   :  { %v808_v0 = vld [vmem:[%s1074_s1 + $0x4] ss:$8 sps:$4 sm:$0xff]   ;;  %274 = vmatprep.mubr.bf16.mxu0 %v840_v1  ;;  %314 = vmatprep.mubr.bf16.mxu1 %v840_v1  ;;  %v810_v2 = vld [vmem:[%s1074_s1] ss:$8 sps:$4 sm:$0xff]   ;;  %v811_v3 = vld [vmem:[%s1074_s1 + $0x14] ss:$8 sps:$4 sm:$0xff]  }
   0x2   :  { %242 = vmatprep.subr.bf16.mxu0 %v808_v0  ;;  %790 = vmatprep.subr.bf16.mxu1 %v808_v0  ;;  %v813_v4 = vld [vmem:[%s1074_s1 + $0x10] ss:$8 sps:$4 sm:$0xff]   ;;  %v814_v5 = vld [vmem:[%s1074_s1 + $0x24] ss:$8 sps:$4 sm:$0xff]   ;;  %v816_v6 = vld [vmem:[%s1074_s1 + $0x20] ss:$8 sps:$4 sm:$0xff]  }
   0x3   :  { %243 = vmatpush1.bf16.msra.mxu0 %v810_v2  ;;  %798 = vmatpush1.bf16.msra.mxu1 %v810_v2  ;;  %v817_v7 = vld [vmem:[%s1074_s1 + $0x34] ss:$8 sps:$4 sm:$0xff]   ;;  %v819_v8 = vld [vmem:[%s1074_s1 + $0x30] ss:$8 sps:$4 sm:$0xff]   ;;  %v820_v9 = vld [vmem:[%s1074_s1 + $0x44] ss:$8 sps:$4 sm:$0xff]  }
   0x4   :  { %244 = vmatprep.subr.bf16.mxu0 %v811_v3  ;;  %791 = vmatprep.subr.bf16.mxu1 %v811_v3  ;;  %v822_v10 = vld [vmem:[%s1074_s1 + $0x40] ss:$8 sps:$4 sm:$0xff]   ;;  %v823_v11 = vld [vmem:[%s1074_s1 + $0x54] ss:$8 sps:$4 sm:$0xff]   ;;  %v825_v12 = vld [vmem:[%s1074_s1 + $0x50] ss:$8 sps:$4 sm:$0xff]  }
   0x5   :  { %v826_v13 = vld [vmem:[%s1074_s1 + $0x64] ss:$8 sps:$4 sm:$0xff]   ;;  %v828_v14 = vld [vmem:[%s1074_s1 + $0x60] ss:$8 sps:$4 sm:$0xff]   ;;  %v829_v15 = vld [vmem:[%s1074_s1 + $0x74] ss:$8 sps:$4 sm:$0xff]  }
   0x6   :  { %v831_v16 = vld [vmem:[%s1074_s1 + $0x70] ss:$8 sps:$4 sm:$0xff]   ;;  %v832_v17 = vld [vmem:[%s1075_s0] sm:$0xff]   ;;  %v833_v19 = vld [vmem:[%s1075_s0 + $0x8] sm:$0xff]  }
   0x7   :  { %245 = vmatpush1.bf16.msra.mxu0 %v813_v4  ;;  %799 = vmatpush1.bf16.msra.mxu1 %v813_v4  ;;  %v834_v18 = vld [vmem:[%s1075_s0 + $0x20] sm:$0xff]   ;;  %v836_v20 = vld [vmem:[%s1075_s0 + $0x28] sm:$0xff]   ;;  %v835_v21 = vld [vmem:[%s1075_s0 + $0x10] sm:$0xff]  }
   0x8   :  { %246 = vmatprep.subr.bf16.mxu0 %v814_v5  ;;  %792 = vmatprep.subr.bf16.mxu1 %v814_v5  ;;  %v838_v22 = vld [vmem:[%s1075_s0 + $0x30] sm:$0xff]   ;;  %v837_v23 = vld [vmem:[%s1075_s0 + $0x18] sm:$0xff]  }
   0x9   :  { %v839_v24 = vld [vmem:[%s1075_s0 + $0x38] sm:$0xff]  }
   0xb   :  { %247 = vmatpush1.bf16.msra.mxu0 %v816_v6  ;;  %800 = vmatpush1.bf16.msra.mxu1 %v816_v6 }
   0xc   :  { %248 = vmatprep.subr.bf16.mxu0 %v817_v7  ;;  %793 = vmatprep.subr.bf16.mxu1 %v817_v7 }
   0xf   :  { %249 = vmatpush1.bf16.msra.mxu0 %v819_v8  ;;  %801 = vmatpush1.bf16.msra.mxu1 %v819_v8 }
  0x10   :  { %250 = vmatprep.subr.bf16.mxu0 %v820_v9  ;;  %794 = vmatprep.subr.bf16.mxu1 %v820_v9 }
  0x13   :  { %251 = vmatpush1.bf16.msra.mxu0 %v822_v10  ;;  %802 = vmatpush1.bf16.msra.mxu1 %v822_v10 }
  0x14   :  { %252 = vmatprep.subr.bf16.mxu0 %v823_v11  ;;  %795 = vmatprep.subr.bf16.mxu1 %v823_v11 }
  0x17   :  { %253 = vmatpush1.bf16.msra.mxu0 %v825_v12  ;;  %803 = vmatpush1.bf16.msra.mxu1 %v825_v12 }
  0x18   :  { %254 = vmatprep.subr.bf16.mxu0 %v826_v13  ;;  %796 = vmatprep.subr.bf16.mxu1 %v826_v13 }
  0x1b   :  { %255 = vmatpush1.bf16.msra.mxu0 %v828_v14  ;;  %804 = vmatpush1.bf16.msra.mxu1 %v828_v14 }
  0x1c   :  { %256 = vmatprep.subr.bf16.mxu0 %v829_v15  ;;  %797 = vmatprep.subr.bf16.mxu1 %v829_v15 }
  0x1f   :  { %257 = vmatpush1.bf16.msra.mxu0 %v831_v16  ;;  %805 = vmatpush1.bf16.msra.mxu1 %v831_v16 }
  0x22   :  { %275 = vmatmul.mubr.bf16.vlgmr.msra.gmra.mrb[0].mxu0 %v832_v17  ;;  %315 = vmatmul.mubr.bf16.vlgmr.msra.gmra.mrb[0].mxu1 %v834_v18 }
  0x23   :  { %284 = vmatprep.mubr.bf16.mxu0 %v840_v1  ;;  %324 = vmatprep.mubr.bf16.mxu1 %v840_v1 }
  0x2a   :  { %285 = vmatmul.mubr.bf16.gmra.mrb[4].mxu0 %v833_v19  ;;  %325 = vmatmul.mubr.bf16.gmra.mrb[4].mxu1 %v836_v20 }
  0x2b   :  { %294 = vmatprep.mubr.bf16.mxu0 %v840_v1  ;;  %334 = vmatprep.mubr.bf16.mxu1 %v840_v1 }
  0x32   :  { %295 = vmatmul.mubr.bf16.gmra.mrb[8].mxu0 %v835_v21  ;;  %335 = vmatmul.mubr.bf16.gmra.mrb[8].mxu1 %v838_v22 }
  0x33   :  { %304 = vmatprep.mubr.bf16.mxu0 %v840_v1  ;;  %344 = vmatprep.mubr.bf16.mxu1 %v840_v1 }
  0x3a   :  { %305 = vmatmul.mubr.bf16.gmra.mrb[12].mxu0 %v837_v23  ;;  %345 = vmatmul.mubr.bf16.gmra.mrb[12].mxu1 %v839_v24 }
  0xf5   :  { %v276_v25 = vpop.f32.mrb[0].mxu0  ;;  %v942_v26 = vpop.f32.mrb[0].mxu1 }
  0xf6   :  { %v278_v27 = vpop.f32.mrb[1].mxu0  ;;  %v944_v28 = vpop.f32.mrb[1].mxu1  ;;  %v631_v33 = vmul.f32 %v276_v25, %v276_v25 }
  0xf7   :  { %v774_v29 = vpack.c.bf16 %v278_v27, %v276_v25  ;;  %v280_v30 = vpop.f32.mrb[2].mxu0  ;;  %v782_v31 = vpack.c.bf16 %v944_v28, %v942_v26  ;;  %v948_v32 = vpop.f32.mrb[2].mxu1  ;;  %v632_v34 = vmul.f32 %v278_v27, %v278_v27 }
  0xf8   :  { %v566_v35 = vadd.f32 %v280_v30, %v276_v25  ;;  %v633_v36 = vmul.f32 %v280_v30, %v280_v30  ;;  %v282_v37 = vpop.f32.mrb[3].mxu0  ;;  %v950_v38 = vpop.f32.mrb[3].mxu1 }
  0xf9   :  { %550 = vst [vmem:[%s1076_s2] sm:$0xff] %v774_v29  ;;  %v775_v39 = vpack.c.bf16 %v282_v37, %v280_v30  ;;  %v587_v40 = vadd.f32 %v282_v37, %v278_v27  ;;  %v634_v41 = vmul.f32 %v282_v37, %v282_v37  ;;  %558 = vst [vmem:[%s1076_s2 + $0x40] sm:$0xff] %v782_v31 }
  0xfa   :  { %v783_v42 = vpack.c.bf16 %v950_v38, %v948_v32  ;;  %v663_v43 = vadd.f32 %v633_v36, %v631_v33 }
  0xfb   :  { %551 = vst [vmem:[%s1076_s2 + $0x8] sm:$0xff] %v775_v39  ;;  %v684_v44 = vadd.f32 %v634_v41, %v632_v34 }
  0xfc   :  { %559 = vst [vmem:[%s1076_s2 + $0x48] sm:$0xff] %v783_v42 }
  0xfd   :  { %v286_v45 = vpop.f32.mrb[4].mxu0  ;;  %v966_v46 = vpop.f32.mrb[4].mxu1 }
  0xfe   :  { %v567_v47 = vadd.f32 %v566_v35, %v286_v45  ;;  %v635_v48 = vmul.f32 %v286_v45, %v286_v45  ;;  %v288_v49 = vpop.f32.mrb[5].mxu0  ;;  %v968_v50 = vpop.f32.mrb[5].mxu1 }
  0xff   :  { %v776_v51 = vpack.c.bf16 %v288_v49, %v286_v45  ;;  %v588_v52 = vadd.f32 %v587_v40, %v288_v49  ;;  %v636_v53 = vmul.f32 %v288_v49, %v288_v49  ;;  %v290_v54 = vpop.f32.mrb[6].mxu0  ;;  %v784_v55 = vpack.c.bf16 %v968_v50, %v966_v46  ;;  %v972_v56 = vpop.f32.mrb[6].mxu1 }
 0x100   :  { %v664_v57 = vadd.f32 %v663_v43, %v635_v48  ;;  %v568_v58 = vadd.f32 %v567_v47, %v290_v54  ;;  %v637_v59 = vmul.f32 %v290_v54, %v290_v54  ;;  %v292_v60 = vpop.f32.mrb[7].mxu0  ;;  %v974_v61 = vpop.f32.mrb[7].mxu1 }
 0x101   :  { %552 = vst [vmem:[%s1076_s2 + $0x10] sm:$0xff] %v776_v51  ;;  %v685_v62 = vadd.f32 %v684_v44, %v636_v53  ;;  %v777_v63 = vpack.c.bf16 %v292_v60, %v290_v54  ;;  %v589_v0 = vadd.f32 %v588_v52, %v292_v60  ;;  %v638_v1 = vmul.f32 %v292_v60, %v292_v60 }
 0x102   :  { %560 = vst [vmem:[%s1076_s2 + $0x50] sm:$0xff] %v784_v55  ;;  %v665_v2 = vadd.f32 %v664_v57, %v637_v59  ;;  %v785_v3 = vpack.c.bf16 %v974_v61, %v972_v56  ;;  %v647_v57 = vmul.f32 %v942_v26, %v942_v26 }
 0x103   :  { %553 = vst [vmem:[%s1076_s2 + $0x18] sm:$0xff] %v777_v63  ;;  %v686_v4 = vadd.f32 %v685_v62, %v638_v1  ;;  %v648_v62 = vmul.f32 %v944_v28, %v944_v28  ;;  %v649_v1 = vmul.f32 %v948_v32, %v948_v32 }
 0x104   :  { %561 = vst [vmem:[%s1076_s2 + $0x58] sm:$0xff] %v785_v3 }
 0x105   :  { %v296_v5 = vpop.f32.mrb[8].mxu0  ;;  %v990_v6 = vpop.f32.mrb[8].mxu1 }
 0x106   :  { %v569_v7 = vadd.f32 %v568_v58, %v296_v5  ;;  %v639_v8 = vmul.f32 %v296_v5, %v296_v5  ;;  %v298_v9 = vpop.f32.mrb[9].mxu0  ;;  %v992_v10 = vpop.f32.mrb[9].mxu1 }
 0x107   :  { %v778_v11 = vpack.c.bf16 %v298_v9, %v296_v5  ;;  %v590_v12 = vadd.f32 %v589_v0, %v298_v9  ;;  %v640_v13 = vmul.f32 %v298_v9, %v298_v9  ;;  %v300_v14 = vpop.f32.mrb[10].mxu0  ;;  %v786_v15 = vpack.c.bf16 %v992_v10, %v990_v6  ;;  %v996_v16 = vpop.f32.mrb[10].mxu1 }
 0x108   :  { %v666_v17 = vadd.f32 %v665_v2, %v639_v8  ;;  %v570_v18 = vadd.f32 %v569_v7, %v300_v14  ;;  %v641_v19 = vmul.f32 %v300_v14, %v300_v14  ;;  %v302_v20 = vpop.f32.mrb[11].mxu0  ;;  %v998_v21 = vpop.f32.mrb[11].mxu1 }
 0x109   :  { %554 = vst [vmem:[%s1076_s2 + $0x20] sm:$0xff] %v778_v11  ;;  %v687_v22 = vadd.f32 %v686_v4, %v640_v13  ;;  %v779_v23 = vpack.c.bf16 %v302_v20, %v300_v14  ;;  %v591_v24 = vadd.f32 %v590_v12, %v302_v20  ;;  %v642_v25 = vmul.f32 %v302_v20, %v302_v20 }
 0x10a   :  { %562 = vst [vmem:[%s1076_s2 + $0x60] sm:$0xff] %v786_v15  ;;  %v667_v27 = vadd.f32 %v666_v17, %v641_v19  ;;  %v787_v29 = vpack.c.bf16 %v998_v21, %v996_v16  ;;  %v653_v12 = vmul.f32 %v972_v56, %v972_v56  ;;  %v656_v20 = vmul.f32 %v992_v10, %v992_v10 }
 0x10b   :  { %555 = vst [vmem:[%s1076_s2 + $0x28] sm:$0xff] %v779_v23  ;;  %v688_v30 = vadd.f32 %v687_v22, %v642_v25 }
 0x10c   :  { %563 = vst [vmem:[%s1076_s2 + $0x68] sm:$0xff] %v787_v29 }
 0x10d   :  { %v306_v31 = vpop.f32.mrb[12].mxu0  ;;  %v1014_v33 = vpop.f32.mrb[12].mxu1 }
 0x10e   :  { %v571_v34 = vadd.f32 %v570_v18, %v306_v31  ;;  %v643_v35 = vmul.f32 %v306_v31, %v306_v31  ;;  %v308_v36 = vpop.f32.mrb[13].mxu0  ;;  %v348_v37 = vpop.f32.mrb[13].mxu1  ;;  %v655_v18 = vmul.f32 %v990_v6, %v990_v6 }
 0x10f   :  { %v780_v39 = vpack.c.bf16 %v308_v36, %v306_v31  ;;  %v592_v40 = vadd.f32 %v591_v24, %v308_v36  ;;  %v644_v41 = vmul.f32 %v308_v36, %v308_v36  ;;  %v310_v42 = vpop.f32.mrb[14].mxu0  ;;  %v788_v43 = vpack.c.bf16 %v348_v37, %v1014_v33  ;;  %v350_v44 = vpop.f32.mrb[14].mxu1 }
 0x110   :  { %v668_v45 = vadd.f32 %v667_v27, %v643_v35  ;;  %v572_v47 = vadd.f32 %v571_v34, %v310_v42  ;;  %v645_v48 = vmul.f32 %v310_v42, %v310_v42  ;;  %v312_v49 = vpop.f32.mrb[15].mxu0  ;;  %v352_v51 = vpop.f32.mrb[15].mxu1  ;;  %v657_v24 = vmul.f32 %v996_v16, %v996_v16 }
 0x111   :  { %556 = vst [vmem:[%s1076_s2 + $0x30] sm:$0xff] %v780_v39  ;;  %v689_v52 = vadd.f32 %v688_v30, %v644_v41  ;;  %v781_v53 = vpack.c.bf16 %v312_v49, %v310_v42  ;;  %v593_v54 = vadd.f32 %v592_v40, %v312_v49  ;;  %v646_v55 = vmul.f32 %v312_v49, %v312_v49 }
 0x112   :  { %564 = vst [vmem:[%s1076_s2 + $0x70] sm:$0xff] %v788_v43  ;;  %v573_v58 = vadd.f32 %v572_v47, %v942_v26  ;;  %v669_v59 = vadd.f32 %v668_v45, %v645_v48  ;;  %v789_v60 = vpack.c.bf16 %v352_v51, %v350_v44  ;;  %v650_v26 = vmul.f32 %v950_v38, %v950_v38 }
 0x113   :  { %557 = vst [vmem:[%s1076_s2 + $0x38] sm:$0xff] %v781_v53  ;;  %v594_v63 = vadd.f32 %v593_v54, %v944_v28  ;;  %v690_v0 = vadd.f32 %v689_v52, %v646_v55  ;;  %v651_v28 = vmul.f32 %v966_v46, %v966_v46  ;;  %v660_v29 = vmul.f32 %v348_v37, %v348_v37 }
 0x114   :  { %v574_v2 = vadd.f32 %v573_v58, %v948_v32  ;;  %v670_v3 = vadd.f32 %v669_v59, %v647_v57  ;;  %565 = vst [vmem:[%s1076_s2 + $0x78] sm:$0xff] %v789_v60  ;;  %v652_v32 = vmul.f32 %v968_v50, %v968_v50  ;;  %v661_v39 = vmul.f32 %v350_v44, %v350_v44 }
 0x115   :  { %v595_v4 = vadd.f32 %v594_v63, %v950_v38  ;;  %v691_v5 = vadd.f32 %v690_v0, %v648_v62  ;;  %v654_v38 = vmul.f32 %v974_v61, %v974_v61  ;;  %v662_v41 = vmul.f32 %v352_v51, %v352_v51 }
 0x116   :  { %v671_v7 = vadd.f32 %v670_v3, %v649_v1  ;;  %v575_v8 = vadd.f32 %v574_v2, %v966_v46  ;;  %v614_v54 = vlaneseq }
 0x117   :  { %v692_v9 = vadd.f32 %v691_v5, %v650_v26  ;;  %v596_v11 = vadd.f32 %v595_v4, %v968_v50 }
 0x118   :  { %v576_v13 = vadd.f32 %v575_v8, %v972_v56  ;;  %v672_v14 = vadd.f32 %v671_v7, %v651_v28  ;;  %vm628_vm0 = vcmp.lt.s32.totalorder %v614_v54, 256 }
 0x119   :  { %v597_v15 = vadd.f32 %v596_v11, %v974_v61  ;;  %v693_v17 = vadd.f32 %v692_v9, %v652_v32  ;;  %v659_v61 = vmul.f32 %v1014_v33, %v1014_v33 }
 0x11a   :  { %v577_v46 = vadd.f32 %v576_v13, %v990_v6  ;;  %v673_v19 = vadd.f32 %v672_v14, %v653_v12  ;;  %v658_v6 = vmul.f32 %v998_v21, %v998_v21 }
 0x11b   :  { %v598_v50 = vadd.f32 %v597_v15, %v992_v10  ;;  %v694_v22 = vadd.f32 %v693_v17, %v654_v38 }
 0x11c   :  { %v674_v56 = vadd.f32 %v673_v19, %v655_v18  ;;  %v578_v23 = vadd.f32 %v577_v46, %v996_v16 }
 0x11d   :  { %v695_v25 = vadd.f32 %v694_v22, %v656_v20  ;;  %v599_v27 = vadd.f32 %v598_v50, %v998_v21  ;;  %v841_v21 = vmov 1966171168  }
 0x11e   :  { %v675_v30 = vadd.f32 %v674_v56, %v657_v24  ;;  %v579_v10 = vadd.f32 %v578_v23, %v1014_v33  ;;  %v612_v53 = vunpack.c.l.s4 %v841_v21 }
 0x11f   :  { %v696_v31 = vadd.f32 %v695_v25, %v658_v6  ;;  %v600_v34 = vadd.f32 %v599_v27, %v348_v37 }
 0x120   :  { %v676_v35 = vadd.f32 %v675_v30, %v659_v61  ;;  %v580_v36 = vadd.f32 %v579_v10, %v350_v44  ;;  %v613_v62 = vunpack.c.0.s8 %v612_v53 }
 0x121   :  { %v697_v40 = vadd.f32 %v696_v31, %v660_v29  ;;  %v601_v16 = vadd.f32 %v600_v34, %v352_v51  ;;  %v615_v51 = vshrl.u32 %v614_v54, 7 }
 0x122   :  { %v581_v42 = vrot.slane %v580_v36, 4  ;;  %v677_v43 = vadd.f32 %v676_v35, %v661_v39 }
 0x123   :  { %v602_v45 = vrot.slane %v601_v16, 4  ;;  %v698_v47 = vadd.f32 %v697_v40, %v662_v41  ;;  %v616_v28 = vsub.s32 %v613_v62, %v615_v51 }
 0x124   :  { %v582_v48 = vadd.f32 %v581_v42, %v580_v36  ;;  %v678_v49 = vrot.slane %v677_v43, 4 }
 0x125   :  { %v603_v52 = vadd.f32 %v602_v45, %v601_v16  ;;  %v699_v55 = vrot.slane %v698_v47, 4 }
 0x126   :  { %v583_v33 = vrot.slane %v582_v48, 2  ;;  %v679_v57 = vadd.f32 %v678_v49, %v677_v43 }
 0x127   :  { %v604_v37 = vrot.slane %v603_v52, 2  ;;  %v700_v58 = vadd.f32 %v699_v55, %v698_v47 }
 0x128   :  { %v584_v59 = vadd.f32 %v583_v33, %v582_v48  ;;  %v680_v44 = vrot.slane %v679_v57, 2 }
 0x129   :  { %v605_v60 = vadd.f32 %v604_v37, %v603_v52  ;;  %v701_v63 = vrot.slane %v700_v58, 2 }
 0x12a   :  { %v585_v0 = vrot.slane %v584_v59, 1  ;;  %v681_v1 = vadd.f32 %v680_v44, %v679_v57 }
 0x12b   :  { %v606_v2 = vrot.slane %v605_v60, 1  ;;  %v702_v3 = vadd.f32 %v701_v63, %v700_v58 }
 0x12c   :  { %v586_v26 = vadd.f32 %v585_v0, %v584_v59  ;;  %v682_v4 = vrot.slane %v681_v1, 1 }
 0x12d   :  { %v607_v5 = vadd.f32 %v606_v2, %v605_v60  ;;  %v703_v7 = vrot.slane %v702_v3, 1 }
 0x12e   :  { %v683_v8 = vadd.f32 %v682_v4, %v681_v1 }
 0x12f   :  { %v610_v32 = vcombine.low %v586_v26, %v607_v5  ;;  %v704_v9 = vadd.f32 %v703_v7, %v702_v3 }
 0x131   :  { %v617_v11 = vrot.slane %v610_v32, %v616_v28  ;;  %v707_v12 = vcombine.low %v683_v8, %v704_v9 }
 0x133   :  { %v624_v13 = vrot.slane %v617_v11, %v616_v28  ;;  %v714_v14 = vrot.slane %v707_v12, %v616_v28 }
 0x135   :  { %630 = vst.msk [vmem:[%s1077_s3] ss:$2 sm:$0x3] %vm628_vm0, %v624_v13  ;;  %v721_v38 = vrot.slane %v714_v14, %v616_v28 }
 0x137   :  { %773 = vst.msk [vmem:[%s1077_s3 + $0x1] ss:$2 sm:$0x3] %vm628_vm0, %v721_v38 }

// kernel: resnet_block_forward.4
= control target key start
LH: loop header
LB: loop body
LE: loop exit
PB: predicated region body
PF: predicated region fallthrough
CT: control target
= control target key end

     0   :  { %s2616_s12 = smov 0   ;;  %s2999_s0 = inlined_call_operand.vmem [shape: bf16[2,10,10,128], index: 0, kind: input, shape index: {}]   ;;  %s3000_s1 = inlined_call_operand.vmem [shape: bf16[3,384,128], index: 1, kind: input, shape index: {}]   ;;  %s3001_s2 = inlined_call_operand.vmem [shape: f32[2,8,8,128], index: 2, kind: output, shape index: {0}]   ;;  %s3002_s3 = inlined_call_operand.vmem [shape: f32[2,2,128], index: 3, kind: output, shape index: {1}]  }
   0x1 LB: > { %s1867_s13 = sadd.s32 4294967295, %s2594_s12   ;;  %p1871_p0 = scmp.ge.s32.totalorder %s2594_s12, 1  ;;  %s2594_s12 = sphi %s2616_s12, %s14_s12  }
   0x2   : > { %p140_p1 = scmp.lt.s32.totalorder %s2594_s12, 3 }
   0x4   : > { %p141_p2 = pnand %p1871_p0, %p140_p1 }
   0x5   : > { %v2456_v0 = vld [vmem:[%s3000_s1 + $0x100] sm:$0xff] (!%p141_p2)   ;;  %v2459_v3 = vld [vmem:[%s3000_s1 + $0x108] sm:$0xff] (!%p141_p2)   ;;  %v2462_v6 = vld [vmem:[%s3000_s1 + $0x110] sm:$0xff] (!%p141_p2)   ;;  %p168_p3 = scmp.lt.s32.totalorder (!%p141_p2), %s1867_s13, 1 }
   0x6   : > { %144 = sbr.rel (%p141_p2) target bundleno = 365 (0x16d), region = 28  ;;  %v2457_v1 = vld [vmem:[%s3000_s1 + $0x140] sm:$0xff] (!%p141_p2)   ;;  %2179 = vmatprep.subr.bf16.mxu0 (!%p141_p2), %v2456_v0  ;;  %v2460_v4 = vld [vmem:[%s3000_s1 + $0x148] sm:$0xff] (!%p141_p2)   ;;  %v2463_v7 = vld [vmem:[%s3000_s1 + $0x150] sm:$0xff] (!%p141_p2)  }
   0x7   : > { %v2458_v2 = vld [vmem:[%s3000_s1 + $0xc0] sm:$0xff] (!%p141_p2)   ;;  %2335 = vmatprep.subr.bf16.mxu1 (!%p141_p2), %v2457_v1  ;;  %v2461_v5 = vld [vmem:[%s3000_s1 + $0xc8] sm:$0xff] (!%p141_p2)   ;;  %v2464_v8 = vld [vmem:[%s3000_s1 + $0xd0] sm:$0xff] (!%p141_p2)  }
   0x8   : > { %2180 = vmatpush3.bf16.msra.mxu0 (!%p141_p2), %v2458_v2  ;;  %2336 = vmatpush3.bf16.msra.mxu1 (!%p141_p2), %v2457_v1  ;;  %v2465_v9 = vld [vmem:[%s3000_s1 + $0x118] sm:$0xff] (!%p141_p2)   ;;  %v2468_v12 = vld [vmem:[%s3000_s1 + $0x120] sm:$0xff] (!%p141_p2)   ;;  %v2471_v15 = vld [vmem:[%s3000_s1 + $0x128] sm:$0xff] (!%p141_p2)  }
   0x9   : > { %2181 = vmatprep.subr.bf16.mxu0 (!%p141_p2), %v2459_v3  ;;  %2337 = vmatprep.subr.bf16.mxu1 (!%p141_p2), %v2460_v4  ;;  %v2466_v10 = vld [vmem:[%s3000_s1 + $0x158] sm:$0xff] (!%p141_p2)   ;;  %v2469_v13 = vld [vmem:[%s3000_s1 + $0x160] sm:$0xff] (!%p141_p2)   ;;  %v2472_v16 = vld [vmem:[%s3000_s1 + $0x168] sm:$0xff] (!%p141_p2)  }
   0xa   : > { %v2467_v11 = vld [vmem:[%s3000_s1 + $0xd8] sm:$0xff] (!%p141_p2)   ;;  %v2470_v14 = vld [vmem:[%s3000_s1 + $0xe0] sm:$0xff] (!%p141_p2)   ;;  %v2473_v17 = vld [vmem:[%s3000_s1 + $0xe8] sm:$0xff] (!%p141_p2)  }
   0xb   : > { %v2474_v18 = vld [vmem:[%s3000_s1 + $0x130] sm:$0xff] (!%p141_p2)   ;;  %v2477_v21 = vld [vmem:[%s3000_s1 + $0x138] sm:$0xff] (!%p141_p2)   ;;  %v2485_v41 = vld [vmem:[%s3000_s1 + $0x40] sm:$0xff] (!%p141_p2)  }
   0xc   : > { %2182 = vmatpush3.bf16.msra.mxu0 (!%p141_p2), %v2461_v5  ;;  %2338 = vmatpush3.bf16.msra.mxu1 (!%p141_p2), %v2460_v4  ;;  %v2475_v19 = vld [vmem:[%s3000_s1 + $0x170] sm:$0xff] (!%p141_p2)   ;;  %v2478_v22 = vld [vmem:[%s3000_s1 + $0x178] sm:$0xff] (!%p141_p2)   ;;  %v2486_v46 = vld [vmem:[%s3000_s1 + $0x80] sm:$0xff] (!%p141_p2)  }
   0xd   : > { %2183 = vmatprep.subr.bf16.mxu0 %v2462_v6  ;;  %2339 = vmatprep.subr.bf16.mxu1 %v2463_v7  ;;  %s3004_s13 = smov (!%p168_p3, %s1867_s13), 1  ;;  %v2476_v20 = vld [vmem:[%s3000_s1 + $0xf0] sm:$0xff]   ;;  %v2479_v35 = vld [vmem:[%s3000_s1 + $0xf8] sm:$0xff]   ;;  %v2491_v57 = vld [vmem:[%s3000_s1] sm:$0xff]  }
   0xe   : > { %s2447_s23 = smul.u32 80, %s3004_s13  ;;  %v2492_v62 = vld [vmem:[%s3000_s1 + $0x48] sm:$0xff]   ;;  %s1875_s19 = sshll.u32 %s3004_s13, 1 }
   0xf   : > { %v2493_v63 = vld [vmem:[%s3000_s1 + $0x88] sm:$0xff]   ;;  %s181_s22 = scalar_lea.vmem %s3002_s3, %s1875_s19 }
  0x10   : > { %2184 = vmatpush3.bf16.msra.mxu0 %v2464_v8  ;;  %2340 = vmatpush3.bf16.msra.mxu1 %v2463_v7  ;;  %s2694_s5 = scalar_lea.vmem %s2999_s0, %s2447_s23  ;;  %v2494_v5 = vld [vmem:[%s3000_s1 + $0x8] sm:$0xff]  }
  0x11   : > { %2185 = vmatprep.subr.bf16.mxu0 %v2465_v9  ;;  %2341 = vmatprep.subr.bf16.mxu1 %v2466_v10  ;;  %v1892_v23 = vld [vmem:[%s2694_s5 + $0x8] sm:$0xf]  ;;  %v1893_v24 = vld [vmem:[%s2694_s5 + $0x10] sm:$0xf]  ;;  %v1900_v25 = vld [vmem:[%s2694_s5 + $0xc] sm:$0x1] }
  0x12   : > { %v1901_v26 = vld [vmem:[%s2694_s5 + $0x14] sm:$0x1]  ;;  %v1916_v27 = vcombine.low %v1892_v23, %v1900_v25  ;;  %v1908_v28 = vld [vmem:[%s2694_s5 + $0x8] sm:$0xe]  ;;  %v1909_v29 = vld [vmem:[%s2694_s5 + $0x10] sm:$0xe]  ;;  %v1980_v58 = vcombine.low %v1892_v23, %v1893_v24 }
  0x13   : > { %v1917_v30 = vcombine.low %v1893_v24, %v1901_v26  ;;  %v1924_v31 = vcombine.low %v1908_v28, %v1900_v25  ;;  %v1925_v32 = vcombine.low %v1909_v29, %v1901_v26  ;;  %v1894_v42 = vld [vmem:[%s2694_s5 + $0x18] sm:$0xf]  ;;  %v1895_v43 = vld [vmem:[%s2694_s5 + $0x20] sm:$0xf]  ;;  %v1902_v47 = vld [vmem:[%s2694_s5 + $0x1c] sm:$0x1] }
  0x14   : > { %2186 = vmatpush3.bf16.msra.mxu0 %v2467_v11  ;;  %2342 = vmatpush3.bf16.msra.mxu1 %v2466_v10  ;;  %v465_v33 = vshrl.u32 %v1916_v27, 16  ;;  %v467_v34 = vshll.u32 %v1916_v27, 16  ;;  %v1903_v48 = vld [vmem:[%s2694_s5 + $0x24] sm:$0x1]  ;;  %v1910_v50 = vld [vmem:[%s2694_s5 + $0x18] sm:$0xe]  ;;  %v1918_v52 = vcombine.low %v1894_v42, %v1902_v47 }
  0x15   : > { %2187 = vmatprep.subr.bf16.mxu0 %v2468_v12  ;;  %2343 = vmatprep.subr.bf16.mxu1 %v2469_v13  ;;  %v472_v36 = vshrl.u32 %v1917_v30, 16  ;;  %v474_v37 = vshll.u32 %v1917_v30, 16  ;;  %v544_v38 = vrot.slane %v1924_v31, 1  ;;  %v545_v39 = vrot.slane %v1925_v32, 1  ;;  %v1911_v51 = vld [vmem:[%s2694_s5 + $0x20] sm:$0xe] }
  0x16   : > { %v469_v40 = vrot.slane %v467_v34, 1  ;;  %v1919_v53 = vcombine.low %v1895_v43, %v1903_v48  ;;  %v1926_v55 = vcombine.low %v1910_v50, %v1902_v47  ;;  %v1927_v56 = vcombine.low %v1911_v51, %v1903_v48  ;;  %v2496_v10 = vld [vmem:[%s3000_s1 + $0x50] sm:$0xff]   ;;  %v2501_v27 = vld [vmem:[%s3000_s1 + $0x18] sm:$0xff]   ;;  %v2505_v30 = vld [vmem:[%s3000_s1 + $0x60] sm:$0xff]  }
  0x17   : > { %v476_v44 = vrot.slane %v474_v37, 1  ;;  %v1982_v45 = vcombine.low %v544_v38, %v545_v39  ;;  %v479_v0 = vshrl.u32 %v1918_v52, 16  ;;  %v481_v1 = vshll.u32 %v1918_v52, 16  ;;  %v2497_v11 = vld [vmem:[%s3000_s1 + $0x90] sm:$0xff]   ;;  %v2506_v31 = vld [vmem:[%s3000_s1 + $0xa0] sm:$0xff]   ;;  %v2508_v38 = vld [vmem:[%s3000_s1 + $0x68] sm:$0xff]  }
  0x18   : > { %2188 = vmatpush3.bf16.msra.mxu0 %v2470_v14  ;;  %2344 = vmatpush3.bf16.msra.mxu1 %v2469_v13  ;;  %v470_v49 = vor.u32 %v469_v40, %v465_v33  ;;  %v546_v60 = vrot.slane %v1926_v55, 1  ;;  %v547_v61 = vrot.slane %v1927_v56, 1  ;;  %v486_v2 = vshrl.u32 %v1919_v53, 16  ;;  %v2498_v14 = vld [vmem:[%s3000_s1 + $0x10] sm:$0xff]   ;;  %v2507_v34 = vld [vmem:[%s3000_s1 + $0x20] sm:$0xff]  }
  0x19   : > { %2189 = vmatprep.subr.bf16.mxu0 %v2471_v15  ;;  %2345 = vmatprep.subr.bf16.mxu1 %v2472_v16  ;;  %v477_v54 = vor.u32 %v476_v44, %v472_v36  ;;  %v488_v3 = vshll.u32 %v1919_v53, 16  ;;  %v483_v6 = vrot.slane %v481_v1, 1  ;;  %v1983_v13 = vcombine.low %v1894_v42, %v1895_v43  ;;  %v1896_v15 = vld [vmem:[%s2694_s5 + $0x28] sm:$0xf]  ;;  %v2773_v36 = vld [vmem:[%s2694_s5 + $0x40] sm:$0xf] }
  0x1a   : > { %2351 = vmatprep.mubr.bf16.mxu1 %v1982_v45  ;;  %v1985_v4 = vcombine.low %v546_v60, %v547_v61  ;;  %v1906_v39 = vld [vmem:[%s2694_s5 + $0x3c] sm:$0x1]  ;;  %v1907_v40 = vld [vmem:[%s2694_s5 + $0x44] sm:$0x1]  ;;  %v1913_v45 = vld [vmem:[%s2694_s5 + $0x30] sm:$0xe] }
  0x1b   : > { %v1981_v59 = vcombine.low %v470_v49, %v477_v54  ;;  %v490_v7 = vrot.slane %v488_v3, 1  ;;  %v484_v8 = vor.u32 %v483_v6, %v479_v0  ;;  %v1923_v44 = vcombine.low %v2773_v36, %v1907_v40  ;;  %v2510_v49 = vld [vmem:[%s3000_s1 + $0x28] sm:$0xff]   ;;  %v2516_v56 = vld [vmem:[%s3000_s1 + $0x70] sm:$0xff]  }
  0x1c   : > { %2190 = vmatpush3.bf16.msra.mxu0 %v2473_v17  ;;  %2346 = vmatpush3.bf16.msra.mxu1 %v2472_v16  ;;  %v1897_v16 = vld [vmem:[%s2694_s5 + $0x30] sm:$0xf]  ;;  %v1904_v17 = vld [vmem:[%s2694_s5 + $0x2c] sm:$0x1] }
  0x1d   : > { %2191 = vmatprep.subr.bf16.mxu0 %v2474_v18  ;;  %2347 = vmatprep.subr.bf16.mxu1 %v2475_v19  ;;  %v491_v9 = vor.u32 %v490_v7, %v486_v2  ;;  %v1905_v18 = vld [vmem:[%s2694_s5 + $0x34] sm:$0x1]  ;;  %v1986_v37 = vcombine.low %v1896_v15, %v1897_v16  ;;  %v514_v52 = vshrl.u32 %v1923_v44, 16  ;;  %v516_v53 = vshll.u32 %v1923_v44, 16  ;;  %v2521_v7 = vld [vmem:[%s3000_s1 + $0x78] sm:$0xff]  }
  0x1e   : > { %817 = vmatprep.mubr.bf16.mxu0 %v1981_v59  ;;  %v1929_v48 = vcombine.low %v1913_v45, %v1905_v18  ;;  %v2517_v0 = vld [vmem:[%s3000_s1 + $0xb0] sm:$0xff]   ;;  %v2534_v45 = vld [vmem:[%s3000_s1 + $0x1c8] sm:$0xff]  }
  0x1f   : > { %v1984_v12 = vcombine.low %v484_v8, %v491_v9  ;;  %v518_v60 = vrot.slane %v516_v53, 1  ;;  %v2536_v53 = vld [vmem:[%s3000_s1 + $0x188] sm:$0xff]  }
  0x20   : > { %2192 = vmatpush3.bf16.msra.mxu0 %v2476_v20  ;;  %2348 = vmatpush3.bf16.msra.mxu1 %v2475_v19  ;;  %v2499_v19 = vld [vmem:[%s3000_s1 + $0x58] sm:$0xff]   ;;  %v1920_v20 = vcombine.low %v1896_v15, %v1904_v17  ;;  %v549_v55 = vrot.slane %v1929_v48, 1  ;;  %v199_v15 = vld [vmem:[%s2694_s5] sm:$0xe]  ;;  %v185_v48 = vld [vmem:[%s2694_s5 + $0x10] sm:$0xf] }
  0x21   : > { %2193 = vmatprep.subr.bf16.mxu0 %v2477_v21  ;;  %2349 = vmatprep.subr.bf16.mxu1 %v2478_v22  ;;  %v1921_v21 = vcombine.low %v1897_v16, %v1905_v18  ;;  %v519_v2 = vor.u32 %v518_v60, %v514_v52  ;;  %v200_v18 = vld [vmem:[%s2694_s5 + $0x8] sm:$0xe]  ;;  %v2541_v60 = vld [vmem:[%s3000_s1 + $0x210] sm:$0xff]  }
  0x22   : > { %v493_v23 = vshrl.u32 %v1920_v20, 16  ;;  %v495_v24 = vshll.u32 %v1920_v20, 16  ;;  %v2523_v20 = vld [vmem:[%s3000_s1 + $0x38] sm:$0xff]  }
  0x23   : > { %v500_v25 = vshrl.u32 %v1921_v21, 16  ;;  %v502_v26 = vshll.u32 %v1921_v21, 16 }
  0x24   : > { %2194 = vmatpush3.bf16.msra.mxu0 %v2479_v35  ;;  %2350 = vmatpush3.bf16.msra.mxu1 %v2478_v22  ;;  %v2500_v22 = vld [vmem:[%s3000_s1 + $0x98] sm:$0xff]   ;;  %v497_v28 = vrot.slane %v495_v24, 1 }
  0x25   : > { %2231 = vmatprep.subr.bf16.mxu0 %v2485_v41  ;;  %2359 = vmatprep.subr.bf16.mxu1 %v2486_v46  ;;  %v504_v29 = vrot.slane %v502_v26, 1  ;;  %v2770_v35 = vld [vmem:[%s2694_s5 + $0x38] sm:$0xf]  ;;  %v1912_v41 = vld [vmem:[%s2694_s5 + $0x28] sm:$0xe]  ;;  %v2529_v26 = vld [vmem:[%s3000_s1 + $0x1c0] sm:$0xff]  }
  0x26   : > { %v498_v32 = vor.u32 %v497_v28, %v493_v23  ;;  %v1922_v43 = vcombine.low %v2770_v35, %v1906_v39  ;;  %v1928_v47 = vcombine.low %v1912_v41, %v1904_v17  ;;  %v1989_v6 = vcombine.low %v2770_v35, %v2773_v36  ;;  %v202_v35 = vld [vmem:[%s2694_s5 + $0x18] sm:$0xe]  ;;  %v2533_v41 = vld [vmem:[%s3000_s1 + $0x180] sm:$0xff]  }
  0x27   : > { %818 = vmatmul.mubr.bf16.vlgmr.msra.gmra.mrb[0].mxu0 %v1980_v58  ;;  %2352 = vmatmul.mubr.bf16.vlgmr.msra.gmra.mrb[0].mxu1 %v1985_v4  ;;  %v505_v33 = vor.u32 %v504_v29, %v500_v25  ;;  %v1915_v58 = vld [vmem:[%s2694_s5 + $0x40] sm:$0xe] }
  0x28   : > { %2232 = vmatpush3.bf16.msra.mxu0 %v2491_v57  ;;  %2360 = vmatpush3.bf16.msra.mxu1 %v2486_v46  ;;  %v2509_v46 = vld [vmem:[%s3000_s1 + $0xa8] sm:$0xff]   ;;  %v507_v50 = vshrl.u32 %v1922_v43, 16  ;;  %v509_v51 = vshll.u32 %v1922_v43, 16  ;;  %v548_v54 = vrot.slane %v1928_v47, 1  ;;  %v1914_v57 = vld [vmem:[%s2694_s5 + $0x38] sm:$0xe] }
  0x29   : > { %2233 = vmatprep.subr.bf16.mxu0 %v2492_v62  ;;  %2361 = vmatprep.subr.bf16.mxu1 %v2493_v63  ;;  %v1987_v42 = vcombine.low %v498_v32, %v505_v33  ;;  %v1930_v61 = vcombine.low %v1914_v57, %v1906_v39  ;;  %v1931_v62 = vcombine.low %v1915_v58, %v1907_v40 }
  0x2a   : > { %825 = vmatprep.mubr.bf16.mxu0 %v1984_v12  ;;  %v511_v59 = vrot.slane %v509_v51, 1  ;;  %v184_v12 = vld [vmem:[%s2694_s5 + $0x8] sm:$0xf] }
  0x2b   : > { %v550_v3 = vrot.slane %v1930_v61, 1  ;;  %v551_v4 = vrot.slane %v1931_v62, 1 }
  0x2c   : > { %2234 = vmatpush3.bf16.msra.mxu0 %v2494_v5  ;;  %2362 = vmatpush3.bf16.msra.mxu1 %v2493_v63  ;;  %v1988_v63 = vcombine.low %v548_v54, %v549_v55  ;;  %v512_v1 = vor.u32 %v511_v59, %v507_v50  ;;  %v2520_v5 = vld [vmem:[%s3000_s1 + $0x30] sm:$0xff]   ;;  %v186_v50 = vld [vmem:[%s2694_s5 + $0x18] sm:$0xf] }
  0x2d   : > { %2235 = vmatprep.subr.bf16.mxu0 %v2496_v10  ;;  %2363 = vmatprep.subr.bf16.mxu1 %v2497_v11  ;;  %v1991_v9 = vcombine.low %v550_v3, %v551_v4  ;;  %v2522_v10 = vld [vmem:[%s3000_s1 + $0xb8] sm:$0xff]   ;;  %v195_v3 = vld [vmem:[%s2694_s5 + $0x24] sm:$0x1]  ;;  %v196_v4 = vld [vmem:[%s2694_s5 + $0x2c] sm:$0x1] }
  0x2e   : > { %2355 = vmatprep.mubr.bf16.mxu1 %v1988_v63  ;;  %v1990_v8 = vcombine.low %v512_v1, %v519_v2  ;;  %v2542_v63 = vld [vmem:[%s3000_s1 + $0x190] sm:$0xff]   ;;  %v2855_v2 = vld [vmem:[%s2694_s5 + $0x28] sm:$0xf] }
  0x2f   : > { %826 = vmatmul.mubr.bf16.gmra.mrb[4].mxu0 %v1983_v13  ;;  %v191_v13 = vld [vmem:[%s2694_s5 + $0x4] sm:$0x1]  ;;  %2356 = vmatmul.mubr.bf16.gmra.mrb[4].mxu1 %v1991_v9 }
  0x30   : > { %2236 = vmatpush3.bf16.msra.mxu0 %v2498_v14  ;;  %2364 = vmatpush3.bf16.msra.mxu1 %v2497_v11  ;;  %v183_v11 = vld [vmem:[%s2694_s5] sm:$0xf]  ;;  %v192_v14 = vld [vmem:[%s2694_s5 + $0xc] sm:$0x1] }
  0x31   : > { %2237 = vmatprep.subr.bf16.mxu0 %v2499_v19  ;;  %2365 = vmatprep.subr.bf16.mxu1 %v2500_v22  ;;  %v1876_v16 = vcombine.low %v183_v11, %v191_v13  ;;  %v1877_v17 = vcombine.low %v184_v12, %v192_v14  ;;  %v1884_v19 = vcombine.low %v199_v15, %v191_v13  ;;  %v2545_v15 = vld [vmem:[%s3000_s1 + $0x198] sm:$0xff]  }
  0x32   : > { %833 = vmatprep.mubr.bf16.mxu0 %v1987_v42  ;;  %v1885_v21 = vcombine.low %v200_v18, %v192_v14  ;;  %v2016_v42 = vcombine.low %v183_v11, %v184_v12  ;;  %v2549_v18 = vld [vmem:[%s3000_s1 + $0x1e0] sm:$0xff]  }
  0x33   : > { %v250_v23 = vshll.u32 %v1876_v16, 16  ;;  %v255_v24 = vshrl.u32 %v1877_v17, 16  ;;  %v257_v25 = vshll.u32 %v1877_v17, 16  ;;  %v327_v28 = vrot.slane %v1884_v19, 1  ;;  %v2550_v19 = vld [vmem:[%s3000_s1 + $0x220] sm:$0xff]  }
  0x34   : > { %2238 = vmatpush3.bf16.msra.mxu0 %v2501_v27  ;;  %2366 = vmatpush3.bf16.msra.mxu1 %v2500_v22  ;;  %v248_v22 = vshrl.u32 %v1876_v16, 16  ;;  %v2530_v27 = vld [vmem:[%s3000_s1 + $0x200] sm:$0xff]   ;;  %v328_v29 = vrot.slane %v1885_v21, 1 }
  0x35   : > { %2239 = vmatprep.subr.bf16.mxu0 %v2505_v30  ;;  %2367 = vmatprep.subr.bf16.mxu1 %v2506_v31  ;;  %v193_v30 = vld [vmem:[%s2694_s5 + $0x14] sm:$0x1]  ;;  %v252_v32 = vrot.slane %v250_v23, 1  ;;  %v259_v33 = vrot.slane %v257_v25, 1  ;;  %v2880_v23 = vld [vmem:[%s2694_s5 + $0x30] sm:$0xf] }
  0x36   : > { %v2018_v36 = vcombine.low %v327_v28, %v328_v29  ;;  %v1878_v51 = vcombine.low %v185_v48, %v193_v30  ;;  %v2552_v25 = vld [vmem:[%s3000_s1 + $0x1e8] sm:$0xff]   ;;  %v197_v28 = vld [vmem:[%s2694_s5 + $0x34] sm:$0x1]  ;;  %v198_v29 = vld [vmem:[%s2694_s5 + $0x3c] sm:$0x1] }
  0x37   : > { %834 = vmatmul.mubr.bf16.gmra.mrb[8].mxu0 %v1986_v37  ;;  %v253_v39 = vor.u32 %v252_v32, %v248_v22  ;;  %v260_v40 = vor.u32 %v259_v33, %v255_v24  ;;  %v2551_v22 = vld [vmem:[%s3000_s1 + $0x1a0] sm:$0xff]  }
  0x38   : > { %2240 = vmatpush3.bf16.msra.mxu0 %v2507_v34  ;;  %2368 = vmatpush3.bf16.msra.mxu1 %v2506_v31  ;;  %v194_v31 = vld [vmem:[%s2694_s5 + $0x1c] sm:$0x1]  ;;  %v201_v34 = vld [vmem:[%s2694_s5 + $0x10] sm:$0xe]  ;;  %v262_v54 = vshrl.u32 %v1878_v51, 16  ;;  %v264_v55 = vshll.u32 %v1878_v51, 16 }
  0x39   : > { %2241 = vmatprep.subr.bf16.mxu0 %v2508_v38  ;;  %2369 = vmatprep.subr.bf16.mxu1 %v2509_v46  ;;  %v1886_v37 = vcombine.low %v201_v34, %v193_v30  ;;  %v1887_v38 = vcombine.low %v202_v35, %v194_v31  ;;  %v2017_v47 = vcombine.low %v253_v39, %v260_v40  ;;  %v203_v33 = vld [vmem:[%s2694_s5 + $0x20] sm:$0xe]  ;;  %v204_v34 = vld [vmem:[%s2694_s5 + $0x28] sm:$0xe]  ;;  %v205_v35 = vld [vmem:[%s2694_s5 + $0x30] sm:$0xe] }
  0x3a   : > { %841 = vmatprep.mubr.bf16.mxu0 %v1990_v8  ;;  %2375 = vmatprep.mubr.bf16.mxu1 %v2018_v36  ;;  %v1879_v52 = vcombine.low %v186_v50, %v194_v31  ;;  %v266_v59 = vrot.slane %v264_v55, 1  ;;  %v1881_v8 = vcombine.low %v2855_v2, %v196_v4  ;;  %v1882_v31 = vcombine.low %v2880_v23, %v197_v28  ;;  %v2554_v40 = vld [vmem:[%s3000_s1 + $0x1a8] sm:$0xff]   ;;  %v2564_v55 = vld [vmem:[%s3000_s1 + $0x1b0] sm:$0xff]  }
  0x3b   : > { %v329_v43 = vrot.slane %v1886_v37, 1  ;;  %v330_v44 = vrot.slane %v1887_v38, 1  ;;  %v1888_v36 = vcombine.low %v203_v33, %v195_v3  ;;  %v1889_v37 = vcombine.low %v204_v34, %v196_v4  ;;  %v206_v38 = vld [vmem:[%s2694_s5 + $0x38] sm:$0xe]  ;;  %v2068_v4 = vld [vmem:[%s2694_s5 + $0x10] sm:$0xe] }
  0x3c   : > { %2242 = vmatpush3.bf16.msra.mxu0 %v2510_v49  ;;  %2370 = vmatpush3.bf16.msra.mxu1 %v2509_v46  ;;  %v2535_v46 = vld [vmem:[%s3000_s1 + $0x208] sm:$0xff]   ;;  %v269_v57 = vshrl.u32 %v1879_v52, 16  ;;  %v271_v58 = vshll.u32 %v1879_v52, 16  ;;  %v267_v62 = vor.u32 %v266_v59, %v262_v54  ;;  %v283_v13 = vshrl.u32 %v1881_v8, 16  ;;  %v2565_v59 = vld [vmem:[%s3000_s1 + $0x1f8] sm:$0xff]  }
  0x3d   : > { %2243 = vmatprep.subr.bf16.mxu0 %v2516_v56  ;;  %2371 = vmatprep.subr.bf16.mxu1 %v2517_v0  ;;  %v2021_v49 = vcombine.low %v329_v43, %v330_v44  ;;  %v2540_v56 = vld [vmem:[%s3000_s1 + $0x1d0] sm:$0xff]   ;;  %v285_v14 = vshll.u32 %v1881_v8, 16  ;;  %v1890_v39 = vcombine.low %v205_v35, %v197_v28 }
  0x3e   : > { %v273_v61 = vrot.slane %v271_v58, 1 }
  0x3f   : > { %842 = vmatmul.mubr.bf16.gmra.mrb[12].mxu0 %v1989_v6  ;;  %v2543_v6 = vld [vmem:[%s3000_s1 + $0x1d8] sm:$0xff]   ;;  %v287_v17 = vrot.slane %v285_v14, 1  ;;  %v2071_v14 = vld [vmem:[%s2694_s5 + $0x28] sm:$0xe] }
  0x40   : > { %2244 = vmatpush3.bf16.msra.mxu0 %v2520_v5  ;;  %2372 = vmatpush3.bf16.msra.mxu1 %v2517_v0  ;;  %v2852_v0 = vld [vmem:[%s2694_s5 + $0x20] sm:$0xf]  ;;  %v274_v1 = vor.u32 %v273_v61, %v269_v57  ;;  %v2019_v5 = vcombine.low %v185_v48, %v186_v50  ;;  %v1891_v48 = vcombine.low %v206_v38, %v198_v29  ;;  %v2563_v50 = vld [vmem:[%s3000_s1 + $0x230] sm:$0xff]  }
  0x41   : > { %2245 = vmatprep.subr.bf16.mxu0 %v2521_v7  ;;  %2373 = vmatprep.subr.bf16.mxu1 %v2522_v10  ;;  %v1880_v7 = vcombine.low %v2852_v0, %v195_v3  ;;  %v288_v21 = vor.u32 %v287_v17, %v283_v13  ;;  %v2022_v24 = vcombine.low %v2852_v0, %v2855_v2  ;;  %v2925_v0 = vld [vmem:[%s2694_s5 + $0x18] sm:$0xf]  ;;  %v2060_v2 = vld [vmem:[%s2694_s5 + $0x14] sm:$0x1]  ;;  %v2061_v3 = vld [vmem:[%s2694_s5 + $0x1c] sm:$0x1] }
  0x42   : > { %1115 = vmatprep.mubr.bf16.mxu0 %v2017_v47  ;;  %v2020_v9 = vcombine.low %v267_v62, %v274_v1  ;;  %v332_v47 = vrot.slane %v1889_v37, 1  ;;  %v334_v54 = vrot.slane %v1891_v48, 1  ;;  %v2566_v62 = vld [vmem:[%s3000_s1 + $0x238] sm:$0xff]   ;;  %v2084_v8 = vcombine.low %v2068_v4, %v2060_v2  ;;  %v2070_v13 = vld [vmem:[%s2694_s5 + $0x20] sm:$0xe] }
  0x43   : > { %v276_v11 = vshrl.u32 %v1880_v7, 16  ;;  %v278_v12 = vshll.u32 %v1880_v7, 16  ;;  %v2567_v1 = vld [vmem:[%s3000_s1 + $0x1b8] sm:$0xff]  }
  0x44   : > { %2246 = vmatpush3.bf16.msra.mxu0 %v2523_v20  ;;  %2374 = vmatpush3.bf16.msra.mxu1 %v2522_v10  ;;  %v2544_v10 = vld [vmem:[%s3000_s1 + $0x218] sm:$0xff]  }
  0x45   : > { %2283 = vmatprep.subr.bf16.mxu0 %v2529_v26  ;;  %2383 = vmatprep.subr.bf16.mxu1 %v2530_v27  ;;  %v280_v16 = vrot.slane %v278_v12, 1  ;;  %v2553_v26 = vld [vmem:[%s3000_s1 + $0x228] sm:$0xff]   ;;  %v2069_v7 = vld [vmem:[%s2694_s5 + $0x18] sm:$0xe] }
  0x46   : > { %v2073_v37 = vld [vmem:[%s2694_s5 + $0x38] sm:$0xe] }
  0x47   : > { %1116 = vmatmul.mubr.bf16.vlgmr.msra.gmra.mrb[16].mxu0 %v2016_v42  ;;  %2376 = vmatmul.mubr.bf16.vlgmr.msra.gmra.mrb[0].mxu1 %v2021_v49  ;;  %v281_v20 = vor.u32 %v280_v16, %v276_v11  ;;  %v292_v42 = vshll.u32 %v1882_v31, 16  ;;  %v333_v49 = vrot.slane %v1890_v39, 1  ;;  %v2085_v11 = vcombine.low %v2069_v7, %v2061_v3 }
  0x48   : > { %2284 = vmatpush3.bf16.msra.mxu0 %v2533_v41  ;;  %2384 = vmatpush3.bf16.msra.mxu1 %v2530_v27  ;;  %v2891_v27 = vld [vmem:[%s2694_s5 + $0x38] sm:$0xf]  ;;  %v290_v41 = vshrl.u32 %v1882_v31, 16  ;;  %v2064_v31 = vld [vmem:[%s2694_s5 + $0x34] sm:$0x1] }
  0x49   : > { %2285 = vmatprep.subr.bf16.mxu0 %v2534_v45  ;;  %2385 = vmatprep.subr.bf16.mxu1 %v2535_v46  ;;  %v2023_v30 = vcombine.low %v281_v20, %v288_v21  ;;  %v1883_v32 = vcombine.low %v2891_v27, %v198_v29  ;;  %v2562_v45 = vld [vmem:[%s3000_s1 + $0x1f0] sm:$0xff]   ;;  %v294_v51 = vrot.slane %v292_v42, 1  ;;  %v2027_v58 = vcombine.low %v333_v49, %v334_v54  ;;  %v2946_v20 = vld [vmem:[%s2694_s5 + $0x28] sm:$0xf]  ;;  %v2066_v49 = vld [vmem:[%s2694_s5 + $0x44] sm:$0x1] }
  0x4a   : > { %1123 = vmatprep.mubr.bf16.mxu0 %v2020_v9  ;;  %v2025_v61 = vcombine.low %v2880_v23, %v2891_v27  ;;  %v2062_v9 = vld [vmem:[%s2694_s5 + $0x24] sm:$0x1]  ;;  %v1358_v21 = vrot.slane %v2084_v8, 1 }
  0x4b   : > { %v297_v43 = vshrl.u32 %v1883_v32, 16  ;;  %v299_v44 = vshll.u32 %v1883_v32, 16  ;;  %v2086_v23 = vcombine.low %v2070_v13, %v2062_v9  ;;  %v2065_v32 = vld [vmem:[%s2694_s5 + $0x3c] sm:$0x1] }
  0x4c   : > { %2286 = vmatpush3.bf16.msra.mxu0 %v2536_v53  ;;  %2386 = vmatpush3.bf16.msra.mxu1 %v2535_v46  ;;  %v331_v46 = vrot.slane %v1888_v36, 1  ;;  %v2072_v36 = vld [vmem:[%s2694_s5 + $0x30] sm:$0xe]  ;;  %v2089_v54 = vcombine.low %v2073_v37, %v2065_v32 }
  0x4d   : > { %2287 = vmatprep.subr.bf16.mxu0 %v2540_v56  ;;  %2387 = vmatprep.subr.bf16.mxu1 %v2541_v60  ;;  %v301_v52 = vrot.slane %v299_v44, 1  ;;  %v295_v56 = vor.u32 %v294_v51, %v290_v41  ;;  %v1360_v34 = vrot.slane %v2086_v23, 1  ;;  %v2059_v44 = vld [vmem:[%s2694_s5 + $0x48] sm:$0xf] }
  0x4e   : > { %v2024_v53 = vcombine.low %v331_v46, %v332_v47 }
  0x4f   : > { %1124 = vmatmul.mubr.bf16.gmra.mrb[20].mxu0 %v2019_v5  ;;  %v302_v57 = vor.u32 %v301_v52, %v297_v43  ;;  %v2058_v43 = vld [vmem:[%s2694_s5 + $0x40] sm:$0xf] }
  0x50   : > { %2288 = vmatpush3.bf16.msra.mxu0 %v2542_v63  ;;  %2388 = vmatpush3.bf16.msra.mxu1 %v2541_v60  ;;  %v2922_v63 = vld [vmem:[%s2694_s5 + $0x10] sm:$0xf] }
  0x51   : > { %2289 = vmatprep.subr.bf16.mxu0 %v2543_v6  ;;  %2389 = vmatprep.subr.bf16.mxu1 %v2544_v10  ;;  %v2026_v60 = vcombine.low %v295_v56, %v302_v57  ;;  %v2076_v5 = vcombine.low %v2922_v63, %v2060_v2  ;;  %v2077_v6 = vcombine.low %v2925_v0, %v2061_v3  ;;  %v2075_v56 = vld [vmem:[%s2694_s5 + $0x48] sm:$0xe] }
  0x52   : > { %1131 = vmatprep.mubr.bf16.mxu0 %v2023_v30  ;;  %2379 = vmatprep.mubr.bf16.mxu1 %v2024_v53  ;;  %v2140_v12 = vcombine.low %v2922_v63, %v2925_v0  ;;  %v2088_v53 = vcombine.low %v2072_v36, %v2064_v31 }
  0x53   : > { %2380 = vmatmul.mubr.bf16.gmra.mrb[4].mxu1 %v2027_v58  ;;  %v1279_v16 = vshrl.u32 %v2076_v5, 16  ;;  %v1281_v17 = vshll.u32 %v2076_v5, 16  ;;  %v2082_v58 = vcombine.low %v2058_v43, %v2066_v49 }
  0x54   : > { %2290 = vmatpush3.bf16.msra.mxu0 %v2545_v15  ;;  %2390 = vmatpush3.bf16.msra.mxu1 %v2544_v10  ;;  %v2063_v10 = vld [vmem:[%s2694_s5 + $0x2c] sm:$0x1]  ;;  %v2943_v15 = vld [vmem:[%s2694_s5 + $0x20] sm:$0xf] }
  0x55   : > { %2291 = vmatprep.subr.bf16.mxu0 %v2549_v18  ;;  %2391 = vmatprep.subr.bf16.mxu1 %v2550_v19  ;;  %v1286_v18 = vshrl.u32 %v2077_v6, 16  ;;  %v1283_v27 = vrot.slane %v1281_v17, 1  ;;  %v2078_v29 = vcombine.low %v2943_v15, %v2062_v9  ;;  %v2079_v30 = vcombine.low %v2946_v20, %v2063_v10 }
  0x56   : > { %v1323_v13 = vshll.u32 %v2082_v58, 16 }
  0x57   : > { %1132 = vmatmul.mubr.bf16.gmra.mrb[24].mxu0 %v2022_v24  ;;  %v2087_v24 = vcombine.low %v2071_v14, %v2063_v10  ;;  %v1284_v39 = vor.u32 %v1283_v27, %v1279_v16  ;;  %v1293_v41 = vshrl.u32 %v2078_v29, 16  ;;  %v1295_v42 = vshll.u32 %v2078_v29, 16 }
  0x58   : > { %2292 = vmatpush3.bf16.msra.mxu0 %v2551_v22  ;;  %2392 = vmatpush3.bf16.msra.mxu1 %v2550_v19  ;;  %v1288_v19 = vshll.u32 %v2077_v6, 16  ;;  %v1359_v22 = vrot.slane %v2085_v11, 1  ;;  %v1300_v46 = vshrl.u32 %v2079_v30, 16  ;;  %v1302_v47 = vshll.u32 %v2079_v30, 16 }
  0x59   : > { %2293 = vmatprep.subr.bf16.mxu0 %v2552_v25  ;;  %2393 = vmatprep.subr.bf16.mxu1 %v2553_v26  ;;  %v2949_v25 = vld [vmem:[%s2694_s5 + $0x30] sm:$0xf]  ;;  %v1361_v35 = vrot.slane %v2087_v24, 1  ;;  %v1297_v52 = vrot.slane %v1295_v42, 1  ;;  %v2143_v14 = vcombine.low %v2943_v15, %v2946_v20  ;;  %v2149_v15 = vcombine.low %v2058_v43, %v2059_v44 }
  0x5a   : > { %1139 = vmatprep.mubr.bf16.mxu0 %v2026_v60  ;;  %v1290_v28 = vrot.slane %v1288_v19, 1  ;;  %v2142_v33 = vcombine.low %v1358_v21, %v1359_v22  ;;  %v2080_v38 = vcombine.low %v2949_v25, %v2064_v31  ;;  %v1304_v57 = vrot.slane %v1302_v47, 1 }
  0x5b   : > { %v1298_v60 = vor.u32 %v1297_v52, %v1293_v41  ;;  %v1321_v19 = vshrl.u32 %v2082_v58, 16  ;;  %v1325_v21 = vrot.slane %v1323_v13, 1 }
  0x5c   : > { %2294 = vmatpush3.bf16.msra.mxu0 %v2554_v40  ;;  %2394 = vmatpush3.bf16.msra.mxu1 %v2553_v26  ;;  %v2952_v26 = vld [vmem:[%s2694_s5 + $0x38] sm:$0xf]  ;;  %v1291_v40 = vor.u32 %v1290_v28, %v1286_v18  ;;  %v1305_v0 = vor.u32 %v1304_v57, %v1300_v46  ;;  %v1307_v2 = vshrl.u32 %v2080_v38, 16  ;;  %v1309_v3 = vshll.u32 %v2080_v38, 16 }
  0x5d   : > { %2295 = vmatprep.subr.bf16.mxu0 %v2562_v45  ;;  %2395 = vmatprep.subr.bf16.mxu1 %v2563_v50  ;;  %v2145_v45 = vcombine.low %v1360_v34, %v1361_v35  ;;  %v2081_v48 = vcombine.low %v2952_v26, %v2065_v32  ;;  %v1326_v27 = vor.u32 %v1325_v21, %v1321_v19 }
  0x5e   : > { %2399 = vmatprep.mubr.bf16.mxu1 %v2142_v33  ;;  %v2141_v51 = vcombine.low %v1284_v39, %v1291_v40  ;;  %v2144_v8 = vcombine.low %v1298_v60, %v1305_v0  ;;  %v1311_v10 = vrot.slane %v1309_v3, 1  ;;  %v2146_v29 = vcombine.low %v2949_v25, %v2952_v26 }
  0x5f   : > { %1140 = vmatmul.mubr.bf16.gmra.mrb[28].mxu0 %v2025_v61  ;;  %v1362_v61 = vrot.slane %v2088_v53, 1  ;;  %v1314_v6 = vshrl.u32 %v2081_v48, 16  ;;  %v1316_v7 = vshll.u32 %v2081_v48, 16 }
  0x60   : > { %2296 = vmatpush3.bf16.msra.mxu0 %v2564_v55  ;;  %2396 = vmatpush3.bf16.msra.mxu1 %v2563_v50  ;;  %v2067_v50 = vld [vmem:[%s2694_s5 + $0x4c] sm:$0x1]  ;;  %v2074_v55 = vld [vmem:[%s2694_s5 + $0x40] sm:$0xe]  ;;  %s2178_s5 = sshll.u32 %s3004_s13, 6 }
  0x61   : > { %2297 = vmatprep.subr.bf16.mxu0 %v2565_v59  ;;  %2397 = vmatprep.subr.bf16.mxu1 %v2566_v62  ;;  %v2083_v59 = vcombine.low %v2059_v44, %v2067_v50  ;;  %v2090_v63 = vcombine.low %v2074_v55, %v2066_v49  ;;  %v1318_v11 = vrot.slane %v1316_v7, 1  ;;  %s2980_s18 = scalar_lea.vmem %s3001_s2, %s2178_s5 }
  0x62   : > { %1631 = vmatprep.mubr.bf16.mxu0 %v2141_v51 }
  0x63   : > { %v1364_v5 = vrot.slane %v2090_v63, 1  ;;  %v1330_v17 = vshll.u32 %v2083_v59, 16  ;;  %v1319_v18 = vor.u32 %v1318_v11, %v1314_v6  ;;  %v1328_v22 = vshrl.u32 %v2083_v59, 16 }
  0x64   : > { %2298 = vmatpush3.bf16.msra.mxu0 %v2567_v1  ;;  %2398 = vmatpush3.bf16.msra.mxu1 %v2566_v62  ;;  %v1363_v62 = vrot.slane %v2089_v54, 1  ;;  %v2091_v1 = vcombine.low %v2075_v56, %v2067_v50 }
  0x65   : > { %v1332_v23 = vrot.slane %v1330_v17, 1 }
  0x66   : > { %v2148_v4 = vcombine.low %v1362_v61, %v1363_v62  ;;  %v1365_v9 = vrot.slane %v2091_v1, 1 }
  0x67   : > { %2400 = vmatmul.mubr.bf16.vlgmr.msra.gmra.mrb[0].mxu1 %v2145_v45  ;;  %1632 = vmatmul.mubr.bf16.vlgmr.msra.gmra.mrb[32].mxu0 %v2140_v12  ;;  %v1312_v12 = vor.u32 %v1311_v10, %v1307_v2  ;;  %v1333_v28 = vor.u32 %v1332_v23, %v1328_v22 }
  0x68   : > { %2403 = vmatprep.mubr.bf16.mxu1 %v2148_v4  ;;  %1639 = vmatprep.mubr.bf16.mxu0 %v2144_v8  ;;  %v2151_v16 = vcombine.low %v1364_v5, %v1365_v9 }
  0x69   : > { %v2147_v24 = vcombine.low %v1312_v12, %v1319_v18  ;;  %v2150_v30 = vcombine.low %v1326_v27, %v1333_v28 }
  0x6f   : > { %2404 = vmatmul.mubr.bf16.gmra.mrb[4].mxu1 %v2151_v16  ;;  %1640 = vmatmul.mubr.bf16.gmra.mrb[36].mxu0 %v2143_v14 }
  0x70   : > { %1647 = vmatprep.mubr.bf16.mxu0 %v2147_v24 }
  0x77   : > { %1648 = vmatmul.mubr.bf16.gmra.mrb[40].mxu0 %v2146_v29 }
  0x78   : > { %1655 = vmatprep.mubr.bf16.mxu0 %v2150_v30 }
  0x7f   : > { %1656 = vmatmul.mubr.bf16.gmra.mrb[44].mxu0 %v2149_v15 }
  0xfa   : > { %v2195_v20 = vpop.f32.mrb[0].mxu0 }
  0xfb   : > { %v2196_v31 = vpop.f32.mrb[1].mxu0 }
  0xfc   : > { %v2197_v32 = vadd.f32 %v2196_v31, %v2195_v20  ;;  %v2198_v33 = vpop.f32.mrb[2].mxu0 }
  0xfd   : > { %v2199_v34 = vpop.f32.mrb[3].mxu0 }
  0xfe   : > { %v2200_v35 = vadd.f32 %v2199_v34, %v2198_v33 }
 0x102   : > { %v2201_v36 = vpop.f32.mrb[4].mxu0 }
 0x103   : > { %v2202_v37 = vpop.f32.mrb[5].mxu0 }
 0x104   : > { %v2203_v38 = vadd.f32 %v2202_v37, %v2201_v36  ;;  %v2204_v39 = vpop.f32.mrb[6].mxu0 }
 0x105   : > { %v2205_v40 = vpop.f32.mrb[7].mxu0 }
 0x106   : > { %v2206_v41 = vadd.f32 %v2205_v40, %v2204_v39 }
 0x10a   : > { %v2207_v42 = vpop.f32.mrb[8].mxu0 }
 0x10b   : > { %v2208_v45 = vpop.f32.mrb[9].mxu0 }
 0x10c   : > { %v2209_v25 = vadd.f32 %v2208_v45, %v2207_v42  ;;  %v2210_v26 = vpop.f32.mrb[10].mxu0 }
 0x10d   : > { %v2211_v46 = vpop.f32.mrb[11].mxu0 }
 0x10e   : > { %v2212_v47 = vadd.f32 %v2211_v46, %v2210_v26 }
 0x112   : > { %v2213_v43 = vpop.f32.mrb[12].mxu0 }
 0x113   : > { %v2214_v44 = vpop.f32.mrb[13].mxu0 }
 0x114   : > { %v2215_v48 = vadd.f32 %v2214_v44, %v2213_v43  ;;  %v2216_v49 = vpop.f32.mrb[14].mxu0 }
 0x115   : > { %v2217_v50 = vpop.f32.mrb[15].mxu0 }
 0x116   : > { %v2218_v51 = vadd.f32 %v2217_v50, %v2216_v49 }
 0x11a   : > { %v2247_v52 = vpop.f32.mrb[16].mxu0 }
 0x11b   : > { %v2248_v53 = vpop.f32.mrb[17].mxu0 }
 0x11c   : > { %v2249_v54 = vadd.f32 %v2248_v53, %v2247_v52  ;;  %v2250_v55 = vpop.f32.mrb[18].mxu0 }
 0x11d   : > { %v2251_v56 = vpop.f32.mrb[19].mxu0 }
 0x11e   : > { %v2410_v57 = vadd.f32 %v2249_v54, %v2197_v32  ;;  %v2252_v58 = vadd.f32 %v2251_v56, %v2250_v55 }
 0x120   : > { %v2416_v59 = vadd.f32 %v2252_v58, %v2200_v35 }
 0x122   : > { %v2253_v60 = vpop.f32.mrb[20].mxu0 }
 0x123   : > { %v2254_v61 = vpop.f32.mrb[21].mxu0 }
 0x124   : > { %v2255_v62 = vadd.f32 %v2254_v61, %v2253_v60  ;;  %v2256_v63 = vpop.f32.mrb[22].mxu0 }
 0x125   : > { %v2257_v0 = vpop.f32.mrb[23].mxu0 }
 0x126   : > { %v2407_v1 = vadd.f32 %v2255_v62, %v2203_v38  ;;  %v2258_v2 = vadd.f32 %v2257_v0, %v2256_v63 }
 0x128   : > { %v2413_v3 = vadd.f32 %v2258_v2, %v2206_v41 }
 0x12a   : > { %v2259_v4 = vpop.f32.mrb[24].mxu0 }
 0x12b   : > { %v2260_v5 = vpop.f32.mrb[25].mxu0 }
 0x12c   : > { %v2261_v6 = vadd.f32 %v2260_v5, %v2259_v4  ;;  %v2262_v7 = vpop.f32.mrb[26].mxu0 }
 0x12d   : > { %v2263_v8 = vpop.f32.mrb[27].mxu0 }
 0x12e   : > { %v2422_v9 = vadd.f32 %v2261_v6, %v2209_v25  ;;  %v2264_v10 = vadd.f32 %v2263_v8, %v2262_v7 }
 0x130   : > { %v2428_v11 = vadd.f32 %v2264_v10, %v2212_v47 }
 0x132   : > { %v2265_v13 = vpop.f32.mrb[28].mxu0 }
 0x133   : > { %v2266_v14 = vpop.f32.mrb[29].mxu0 }
 0x134   : > { %v2267_v16 = vadd.f32 %v2266_v14, %v2265_v13  ;;  %v2268_v12 = vpop.f32.mrb[30].mxu0 }
 0x135   : > { %v2269_v17 = vpop.f32.mrb[31].mxu0 }
 0x136   : > { %v2972_v18 = vadd.f32 %v2267_v16, %v2215_v48  ;;  %v2270_v19 = vadd.f32 %v2269_v17, %v2268_v12 }
 0x138   : > { %v2974_v21 = vadd.f32 %v2270_v19, %v2218_v51 }
 0x13a   : > { %v2401_v22 = vpop.f32.mrb[0].mxu1  ;;  %v2299_v24 = vpop.f32.mrb[32].mxu0 }
 0x13b   : > { %v1698_v23 = vpop.f32.mrb[1].mxu1  ;;  %v2300_v28 = vpop.f32.mrb[33].mxu0 }
 0x13c   : > { %v2402_v27 = vpop.f32.mrb[2].mxu1  ;;  %v2301_v30 = vadd.f32 %v2300_v28, %v2299_v24  ;;  %v2302_v15 = vpop.f32.mrb[34].mxu0 }
 0x13d   : > { %v1701_v29 = vpop.f32.mrb[3].mxu1  ;;  %v2303_v20 = vpop.f32.mrb[35].mxu0 }
 0x13e   : > { %v2411_v31 = vadd.f32 %v2410_v57, %v2301_v30  ;;  %v2304_v32 = vadd.f32 %v2303_v20, %v2302_v15 }
 0x140   : > { %v2412_v33 = vadd.f32 %v2411_v31, %v1698_v23  ;;  %v2417_v34 = vadd.f32 %v2416_v59, %v2304_v32 }
 0x142   : > { %v2405_v35 = vpop.f32.mrb[4].mxu1  ;;  %1737 = vst [vmem:[%s2980_s18] sm:$0xff] %v2412_v33  ;;  %v2418_v37 = vadd.f32 %v2417_v34, %v1701_v29  ;;  %v2305_v38 = vpop.f32.mrb[36].mxu0  ;;  %v1759_v42 = vmul.f32 %v2412_v33, %v2412_v33 }
 0x143   : > { %v1714_v36 = vpop.f32.mrb[5].mxu1  ;;  %v2306_v40 = vpop.f32.mrb[37].mxu0 }
 0x144   : > { %v2406_v39 = vpop.f32.mrb[6].mxu1  ;;  %1738 = vst [vmem:[%s2980_s18 + $0x8] sm:$0xff] %v2418_v37  ;;  %v1745_v45 = vadd.f32 %v2418_v37, %v2412_v33  ;;  %v1760_v25 = vmul.f32 %v2418_v37, %v2418_v37  ;;  %v2307_v26 = vadd.f32 %v2306_v40, %v2305_v38  ;;  %v2308_v46 = vpop.f32.mrb[38].mxu0 }
 0x145   : > { %v1717_v41 = vpop.f32.mrb[7].mxu1  ;;  %v2309_v47 = vpop.f32.mrb[39].mxu0 }
 0x146   : > { %v1767_v43 = vadd.f32 %v1760_v25, %v1759_v42  ;;  %v2408_v44 = vadd.f32 %v2407_v1, %v2307_v26  ;;  %v2310_v48 = vadd.f32 %v2309_v47, %v2308_v46 }
 0x148   : > { %v2409_v49 = vadd.f32 %v2408_v44, %v2401_v22  ;;  %v2414_v50 = vadd.f32 %v2413_v3, %v2310_v48 }
 0x14a   : > { %1739 = vst [vmem:[%s2980_s18 + $0x10] sm:$0xff] %v2409_v49  ;;  %v1746_v51 = vadd.f32 %v2409_v49, %v1745_v45  ;;  %v1761_v52 = vmul.f32 %v2409_v49, %v2409_v49  ;;  %v2415_v53 = vadd.f32 %v2414_v50, %v2402_v27  ;;  %v2311_v54 = vpop.f32.mrb[40].mxu0 }
 0x14b   : > { %v2312_v55 = vpop.f32.mrb[41].mxu0 }
 0x14c   : > { %v1768_v56 = vadd.f32 %v1767_v43, %v1761_v52  ;;  %1740 = vst [vmem:[%s2980_s18 + $0x18] sm:$0xff] %v2415_v53  ;;  %v1747_v57 = vadd.f32 %v2415_v53, %v1746_v51  ;;  %v1762_v58 = vmul.f32 %v2415_v53, %v2415_v53  ;;  %v2313_v59 = vadd.f32 %v2312_v55, %v2311_v54  ;;  %v2314_v60 = vpop.f32.mrb[42].mxu0 }
 0x14d   : > { %v2315_v61 = vpop.f32.mrb[43].mxu0 }
 0x14e   : > { %v1769_v62 = vadd.f32 %v1768_v56, %v1762_v58  ;;  %v2423_v63 = vadd.f32 %v2422_v9, %v2313_v59  ;;  %v2316_v0 = vadd.f32 %v2315_v61, %v2314_v60 }
 0x150   : > { %v2424_v1 = vadd.f32 %v2423_v63, %v1714_v36  ;;  %v2429_v2 = vadd.f32 %v2428_v11, %v2316_v0 }
 0x152   : > { %1741 = vst [vmem:[%s2980_s18 + $0x20] sm:$0xff] %v2424_v1  ;;  %v1748_v3 = vadd.f32 %v2424_v1, %v1747_v57  ;;  %v1763_v4 = vmul.f32 %v2424_v1, %v2424_v1  ;;  %v2430_v5 = vadd.f32 %v2429_v2, %v1717_v41  ;;  %v2317_v6 = vpop.f32.mrb[44].mxu0 }
 0x153   : > { %v2318_v7 = vpop.f32.mrb[45].mxu0 }
 0x154   : > { %v1770_v8 = vadd.f32 %v1769_v62, %v1763_v4  ;;  %1742 = vst [vmem:[%s2980_s18 + $0x28] sm:$0xff] %v2430_v5  ;;  %v1749_v10 = vadd.f32 %v2430_v5, %v1748_v3  ;;  %v1764_v13 = vmul.f32 %v2430_v5, %v2430_v5  ;;  %v2319_v14 = vadd.f32 %v2318_v7, %v2317_v6  ;;  %v2320_v16 = vpop.f32.mrb[46].mxu0 }
 0x155   : > { %v2321_v12 = vpop.f32.mrb[47].mxu0 }
 0x156   : > { %v1771_v17 = vadd.f32 %v1770_v8, %v1764_v13  ;;  %v2420_v9 = vadd.f32 %v2972_v18, %v2319_v14  ;;  %v2322_v19 = vadd.f32 %v2321_v12, %v2320_v16 }
 0x158   : > { %v2421_v11 = vadd.f32 %v2420_v9, %v2405_v35  ;;  %v2426_v22 = vadd.f32 %v2974_v21, %v2322_v19 }
 0x15a   : > { %1743 = vst [vmem:[%s2980_s18 + $0x30] sm:$0xff] %v2421_v11  ;;  %v1750_v23 = vadd.f32 %v2421_v11, %v1749_v10  ;;  %v1765_v24 = vmul.f32 %v2421_v11, %v2421_v11  ;;  %v2427_v27 = vadd.f32 %v2426_v22, %v2406_v39 }
 0x15c   : > { %v1772_v28 = vadd.f32 %v1771_v17, %v1765_v24  ;;  %1744 = vst [vmem:[%s2980_s18 + $0x38] sm:$0xff] %v2427_v27  ;;  %v1751_v29 = vadd.f32 %v2427_v27, %v1750_v23  ;;  %v1766_v30 = vmul.f32 %v2427_v27, %v2427_v27 }
 0x15e   : > { %v1752_v15 = vrot.slane %v1751_v29, 4  ;;  %v1773_v20 = vadd.f32 %v1772_v28, %v1766_v30 }
 0x160   : > { %v1753_v31 = vadd.f32 %v1752_v15, %v1751_v29  ;;  %v1774_v32 = vrot.slane %v1773_v20, 4 }
 0x162   : > { %v1754_v33 = vrot.slane %v1753_v31, 2  ;;  %v1775_v34 = vadd.f32 %v1774_v32, %v1773_v20 }
 0x164   : > { %v1755_v18 = vadd.f32 %v1754_v33, %v1753_v31  ;;  %v1776_v35 = vrot.slane %v1775_v34, 2 }
 0x166   : > { %v1756_v36 = vrot.slane %v1755_v18, 1  ;;  %v1777_v37 = vadd.f32 %v1776_v35, %v1775_v34 }
 0x168   : > { %v1757_v21 = vadd.f32 %v1756_v36, %v1755_v18  ;;  %v1778_v38 = vrot.slane %v1777_v37, 1 }
 0x16a   : > { %1758 = vst [vmem:[%s181_s22] sm:$0x1] %v1757_v21  ;;  %v1779_v39 = vadd.f32 %v1778_v38, %v1777_v37 }
 0x16c   : > { %1780 = vst [vmem:[%s181_s22 + $0x1] sm:$0x1] %v1779_v39 }
 0x16d PF: > { %s14_s12 = sadd.s32 1, %s2594_s12  }
 0x16e   : > { %p11_p4 = scmp.ge.s32.totalorder %s14_s12, 4  }
 0x170   :  { %13 = sbr.rel (!%p11_p4) target bundleno = 1 (0x1), region = 74 }

</bundles_post_ra>
